<compile_context>
chip_gen: v7x
topology: tpu7x:2x2x1
jax: 0.10.0
libtpu: 0.0.40
codegen_flags: <defaults>
</compile_context>

<pallas_src>
import functools

import jax
import jax.numpy as jnp
from jax.experimental import pallas as pl
from jax.experimental.pallas import tpu as pltpu


def _fused_kernel(x1_ref, x2_ref, w12_ref, b1_ref, w3_ref, b3_ref, o_ref,
                  xp_ref, patch_ref, *, H, W, B_TILE):
    C = x1_ref.shape[1]
    HW = H * W
    f32 = jnp.float32

    # Padded flat image layout in xp_ref: [W+1 zeros | img (HW) | W+1 zeros].
    # Halos are zeroed once; the per-image interior store below only touches
    # [W+1, W+1+HW), so the zeros persist across images and grid steps.
    @pl.when(pl.program_id(0) == 0)
    def _():
        xp_ref[:, :W + 1] = jnp.zeros((C, W + 1), f32)
        xp_ref[:, W + 1 + HW:] = jnp.zeros((C, W + 1), f32)

    # Hoisted row-wraparound masks for the flattened layout; (1, HW) rows
    # broadcast over C.
    wq = jax.lax.broadcasted_iota(jnp.int32, (1, HW), 1) % W
    mask_l = wq != 0          # kw == 0 tap needs column w-1 (invalid at w==0)
    mask_r = wq != W - 1      # kw == 2 tap needs column w+1 (invalid at w==W-1)

    def build_patch(x_ref):
        # im2col of all B_TILE images into the shared (9C, B_TILE*HW) scratch.
        # Row order: tap-major (kh, kw), cin-minor -- matches _pack_weight.
        for b in range(B_TILE):
            xp_ref[:, W + 1:W + 1 + HW] = x_ref[b]
            col = b * HW                               # lane-aligned (HW%128==0)
            for kh in range(3):
                for kw in range(3):
                    start = kh * W + kw                # flat shift of this tap
                    p = xp_ref[:, start:start + HW]    # (C, HW)
                    if kw == 0:
                        p = jnp.where(mask_l, p, 0.0)
                    elif kw == 2:
                        p = jnp.where(mask_r, p, 0.0)
                    row = (kh * 3 + kw) * C
                    patch_ref[row:row + C, col:col + HW] = p

    # conv1(x2) and conv2(x2) fused into one (2C x 9C)@(9C x B_TILE*HW) matmul;
    # then the patch scratch is reused for conv3(x1) (build-and-consume).
    build_patch(x2_ref)
    c12 = jnp.dot(w12_ref[...], patch_ref[...],
                  preferred_element_type=jnp.float32)          # (2C, B_TILE*HW)
    build_patch(x1_ref)
    c3 = jnp.dot(w3_ref[...], patch_ref[...],
                 preferred_element_type=jnp.float32) + b3_ref[...]  # (C, ...)

    c1 = c12[:C] + b1_ref[...]      # conv1 bias
    c2 = c12[C:]                    # conv2 has no bias

    # Elementwise epilogue + store, per image (all slices lane-aligned).
    for b in range(B_TILE):
        sl = slice(b * HW, (b + 1) * HW)
        x1b = x1_ref[b]                                        # (C, HW)
        v2 = jnp.maximum(x1b + c1[:, sl], 0.0)                 # relu(x1+conv1(x2))
        v4 = jnp.maximum(v2 + c3[:, sl], 0.0)                  # relu(v2+conv3(x1))
        o_ref[b] = jax.nn.sigmoid(v4 + c2[:, sl])              # sigmoid(v4+conv2(x2))


def _pack_weight(w_oihw, C):
    # (Cout, Cin, 3, 3) OIHW -> (Cout, 9*Cin) with (kh, kw, cin) column order,
    # matching the im2col row order (tap-major, cin-minor).
    return jnp.transpose(w_oihw, (0, 2, 3, 1)).reshape(C, 9 * C)


def _choose_b_tile(N, cap=8):
    # cap=8 keeps live VMEM (~2.5 MB with double-buffered I/O) comfortably
    # under v5e's 16 MiB scoped default and v7x's 64 MiB physical VMEM.
    bt = max(1, min(cap, N))
    if N >= 2:
        bt = min(bt, (N + 1) // 2)   # ensure >= 2 grid steps (v7x: 2 TCs)
    return bt


def fused_forward(x1, x2, w1, b1, w2, w3, b3, *, b_tile=None):
    """x1, x2: (N, C, H, W) f32.  w*: (Cout, Cin, 3, 3) OIHW.  b*: (C,)."""
    N, C, H, W = x1.shape
    HW = H * W
    assert HW % 128 == 0 and C % 8 == 0, "need lane/sublane-aligned C, H*W"

    if b_tile is None:
        b_tile = _choose_b_tile(N)
    n_steps = -(-N // b_tile)
    N_pad = n_steps * b_tile

    # Free metadata reshapes (contiguous): activations live as (N, C, HW).
    x1f = x1.reshape(N, C, HW)
    x2f = x2.reshape(N, C, HW)
    if N_pad != N:
        pad = ((0, N_pad - N), (0, 0), (0, 0))
        x1f = jnp.pad(x1f, pad)
        x2f = jnp.pad(x2f, pad)

    w12 = jnp.concatenate([_pack_weight(w1, C), _pack_weight(w2, C)], axis=0)
    w3p = _pack_weight(w3, C)
    b1c = b1.reshape(C, 1)
    b3c = b3.reshape(C, 1)

    PAD = HW + 2 * W + 2

    x_spec = pl.BlockSpec((b_tile, C, HW), lambda n: (n, 0, 0))
    w12_spec = pl.BlockSpec((2 * C, 9 * C), lambda n: (0, 0))
    w3_spec = pl.BlockSpec((C, 9 * C), lambda n: (0, 0))
    b1_spec = pl.BlockSpec((C, 1), lambda n: (0, 0))
    b3_spec = pl.BlockSpec((C, 1), lambda n: (0, 0))
    out_spec = pl.BlockSpec((b_tile, C, HW), lambda n: (n, 0, 0))

    cost = pl.CostEstimate(
        flops=int(N_pad * (2 * (3 * C) * (9 * C) * HW + 6 * C * HW)),
        transcendentals=int(N_pad * C * HW),
        bytes_accessed=int(N_pad * 3 * C * HW * 4 + (3 * C * 9 * C + 2 * C) * 4),
    )

    out = pl.pallas_call(
        functools.partial(_fused_kernel, H=H, W=W, B_TILE=b_tile),
        out_shape=jax.ShapeDtypeStruct((N_pad, C, HW), jnp.float32),
        grid=(n_steps,),
        in_specs=[x_spec, x_spec, w12_spec, b1_spec, w3_spec, b3_spec],
        out_specs=out_spec,
        scratch_shapes=[
            pltpu.VMEM((C, PAD), jnp.float32),            # padded flat image
            pltpu.VMEM((9 * C, b_tile * HW), jnp.float32),  # shared im2col patch
        ],
        compiler_params=pltpu.CompilerParams(
            dimension_semantics=("parallel",)),
        cost_estimate=cost,
    )(x1f, x2f, w12, b1c, w3p, b3c)
    return out[:N].reshape(N, C, H, W)


def _conv_ref(x, w_oihw, b=None):
    y = jax.lax.conv_general_dilated(
        x, w_oihw, window_strides=(1, 1), padding="SAME",
        dimension_numbers=("NCHW", "OIHW", "NCHW"))
    if b is not None:
        y = y + b.reshape(1, -1, 1, 1)
    return y


def _ref_forward(x1, x2, w1, b1, w2, w3, b3):
    v1 = x1 + _conv_ref(x2, w1, b1)
    v2 = jax.nn.relu(v1)
    v3 = v2 + _conv_ref(x1, w3, b3)
    v4 = jax.nn.relu(v3)
    v5 = v4 + _conv_ref(x2, w2)
    return jax.nn.sigmoid(v5)


if __name__ == "__main__":
    # Small shapes consistent with the module: C=16 fixed by Conv2d(16,16,3);
    # N=4 exercises batch tiling (B_TILE=2, grid=2), spatial kept small.
    N, C, H, W = 4, 16, 16, 16
    key = jax.random.PRNGKey(0)
    k = jax.random.split(key, 7)

    x1 = jax.random.normal(k[0], (N, C, H, W), jnp.float32)
    x2 = jax.random.normal(k[1], (N, C, H, W), jnp.float32)

    # Deterministic "parameters" (PyTorch-native OIHW layout), torch-like init.
    scale = 1.0 / jnp.sqrt(C * 3.0 * 3.0)
    w1 = jax.random.uniform(k[2], (C, C, 3, 3), jnp.float32, -scale, scale)
    w2 = jax.random.uniform(k[3], (C, C, 3, 3), jnp.float32, -scale, scale)
    w3 = jax.random.uniform(k[4], (C, C, 3, 3), jnp.float32, -scale, scale)
    b1 = jax.random.uniform(k[5], (C,), jnp.float32, -scale, scale)
    b3 = jax.random.uniform(k[6], (C,), jnp.float32, -scale, scale)

    out = jax.block_until_ready(fused_forward(x1, x2, w1, b1, w2, w3, b3))

    ref = _ref_forward(x1, x2, w1, b1, w2, w3, b3)
    assert out.shape == (N, C, H, W)
    err = float(jnp.max(jnp.abs(out - ref)))
    assert jnp.allclose(out, ref, atol=1e-5, rtol=1e-5), err

    print("KERNEL_OK")
</pallas_src>

<mosaic_0001>
module attributes {stable_mosaic.version = 11 : i64} {
  func.func @_fused_kernel(%arg0: i32, %arg1: memref<2x16x256xf32, #tpu.memory_space<vmem>>, %arg2: memref<2x16x256xf32, #tpu.memory_space<vmem>>, %arg3: memref<32x144xf32, #tpu.memory_space<vmem>>, %arg4: memref<16x1xf32, #tpu.memory_space<vmem>>, %arg5: memref<16x144xf32, #tpu.memory_space<vmem>>, %arg6: memref<16x1xf32, #tpu.memory_space<vmem>>, %arg7: memref<2x16x256xf32, #tpu.memory_space<vmem>>, %arg8: memref<16x290xf32, #tpu.memory_space<vmem>>, %arg9: memref<144x512xf32, #tpu.memory_space<vmem>>) attributes {dimension_semantics = [#tpu.dimension_semantics<parallel>], iteration_bounds = array<i64: 2>, scalar_prefetch = 0 : i64, scratch_operands = 2 : i64, tpu.core_type = #tpu.core_type<tc>, window_params = [{transform_indices = @transform_0, window_bounds = array<i64: 2, 16, 256>}, {transform_indices = @transform_1, window_bounds = array<i64: 2, 16, 256>}, {pipeline_mode = #tpu.pipeline_mode<synchronous>, transform_indices = @transform_2, window_bounds = array<i64: 32, 144>}, {pipeline_mode = #tpu.pipeline_mode<synchronous>, transform_indices = @transform_3, window_bounds = array<i64: 16, 1>}, {pipeline_mode = #tpu.pipeline_mode<synchronous>, transform_indices = @transform_4, window_bounds = array<i64: 16, 144>}, {pipeline_mode = #tpu.pipeline_mode<synchronous>, transform_indices = @transform_5, window_bounds = array<i64: 16, 1>}, {transform_indices = @transform_6, window_bounds = array<i64: 2, 16, 256>}]} {
    %c0_i32 = arith.constant 0 : i32
    %0 = arith.cmpi eq, %arg0, %c0_i32 : i32
    %1 = arith.extui %0 : i1 to i32
    %c0_i32_0 = arith.constant 0 : i32
    %2 = arith.cmpi ne, %1, %c0_i32_0 : i32
    scf.if %2 {
      %cst_209 = arith.constant 0.000000e+00 : f32
      %258 = vector.broadcast %cst_209 : f32 to vector<16x17xf32>
      %c0_210 = arith.constant 0 : index
      %c0_211 = arith.constant 0 : index
      %259 = vector.load %arg8[%c0_210, %c0_211] : memref<16x290xf32, #tpu.memory_space<vmem>>, vector<16x17xf32>
      tpu.vector_store %arg8[%c0_210, %c0_211], %258 {strides = array<i32>} : memref<16x290xf32, #tpu.memory_space<vmem>>, vector<16x17xf32>,
      %cst_212 = arith.constant 0.000000e+00 : f32
      %260 = vector.broadcast %cst_212 : f32 to vector<16x17xf32>
      %c0_213 = arith.constant 0 : index
      %c273 = arith.constant 273 : index
      %261 = vector.load %arg8[%c0_213, %c273] : memref<16x290xf32, #tpu.memory_space<vmem>>, vector<16x17xf32>
      tpu.vector_store %arg8[%c0_213, %c273], %260 {strides = array<i32>} : memref<16x290xf32, #tpu.memory_space<vmem>>, vector<16x17xf32>,
    } else {
    }
    %3 = tpu.iota {dimensions = array<i32: 1>} : vector<1x256xi32>
    %c16_i32 = arith.constant 16 : i32
    %c0_i32_1 = arith.constant 0 : i32
    %4 = arith.cmpi eq, %c16_i32, %c0_i32_1 : i32
    %c1_i32 = arith.constant 1 : i32
    %5 = arith.select %4, %c1_i32, %c16_i32 : i32
    %6 = vector.broadcast %5 : i32 to vector<1x256xi32>
    %7 = arith.remsi %3, %6 : vector<1x256xi32>
    %c0_i32_2 = arith.constant 0 : i32
    %8 = vector.broadcast %c0_i32_2 : i32 to vector<1x256xi32>
    %9 = arith.cmpi ne, %7, %8 : vector<1x256xi32>
    %c0_i32_3 = arith.constant 0 : i32
    %10 = vector.broadcast %c0_i32_3 : i32 to vector<1x256xi32>
    %11 = arith.cmpi slt, %7, %10 : vector<1x256xi32>
    %c0_i32_4 = arith.constant 0 : i32
    %12 = arith.cmpi slt, %5, %c0_i32_4 : i32
    %13 = vector.broadcast %12 : i1 to vector<1x256xi1>
    %14 = vector.broadcast %13 : vector<1x256xi1> to vector<1x256xi1>
    %15 = arith.xori %11, %14 : vector<1x256xi1>
    %16 = arith.andi %15, %9 : vector<1x256xi1>
    %17 = vector.broadcast %5 : i32 to vector<1x256xi32>
    %18 = arith.addi %7, %17 : vector<1x256xi32>
    %19 = arith.select %16, %18, %7 : vector<1x256xi1>, vector<1x256xi32>
    %c0_i32_5 = arith.constant 0 : i32
    %20 = vector.broadcast %c0_i32_5 : i32 to vector<1x256xi32>
    %21 = arith.cmpi ne, %19, %20 : vector<1x256xi32>
    %c15_i32 = arith.constant 15 : i32
    %22 = vector.broadcast %c15_i32 : i32 to vector<1x256xi32>
    %23 = arith.cmpi ne, %19, %22 : vector<1x256xi32>
    %c0 = arith.constant 0 : index
    %c0_6 = arith.constant 0 : index
    %c0_7 = arith.constant 0 : index
    %24 = vector.load %arg2[%c0, %c0_6, %c0_7] : memref<2x16x256xf32, #tpu.memory_space<vmem>>, vector<1x16x256xf32>
    %25 = vector.shape_cast %24 : vector<1x16x256xf32> to vector<16x256xf32>
    %c0_8 = arith.constant 0 : index
    %c17 = arith.constant 17 : index
    %26 = vector.load %arg8[%c0_8, %c17] : memref<16x290xf32, #tpu.memory_space<vmem>>, vector<16x256xf32>
    tpu.vector_store %arg8[%c0_8, %c17], %25 {strides = array<i32>} : memref<16x290xf32, #tpu.memory_space<vmem>>, vector<16x256xf32>,
    %c0_9 = arith.constant 0 : index
    %c0_10 = arith.constant 0 : index
    %27 = vector.load %arg8[%c0_9, %c0_10] : memref<16x290xf32, #tpu.memory_space<vmem>>, vector<16x256xf32>
    %cst = arith.constant 0.000000e+00 : f32
    %28 = vector.shape_cast %21 : vector<1x256xi1> to vector<1x256xi1>
    %29 = vector.broadcast %28 : vector<1x256xi1> to vector<16x256xi1>
    %30 = vector.broadcast %cst : f32 to vector<16x256xf32>
    %31 = arith.select %29, %27, %30 : vector<16x256xi1>, vector<16x256xf32>
    %c0_11 = arith.constant 0 : index
    %c0_12 = arith.constant 0 : index
    %32 = vector.load %arg9[%c0_11, %c0_12] : memref<144x512xf32, #tpu.memory_space<vmem>>, vector<16x256xf32>
    tpu.vector_store %arg9[%c0_11, %c0_12], %31 {strides = array<i32>} : memref<144x512xf32, #tpu.memory_space<vmem>>, vector<16x256xf32>,
    %c0_13 = arith.constant 0 : index
    %c1 = arith.constant 1 : index
    %33 = vector.load %arg8[%c0_13, %c1] : memref<16x290xf32, #tpu.memory_space<vmem>>, vector<16x256xf32>
    %c16 = arith.constant 16 : index
    %c0_14 = arith.constant 0 : index
    %34 = vector.load %arg9[%c16, %c0_14] : memref<144x512xf32, #tpu.memory_space<vmem>>, vector<16x256xf32>
    tpu.vector_store %arg9[%c16, %c0_14], %33 {strides = array<i32>} : memref<144x512xf32, #tpu.memory_space<vmem>>, vector<16x256xf32>,
    %c0_15 = arith.constant 0 : index
    %c2 = arith.constant 2 : index
    %35 = vector.load %arg8[%c0_15, %c2] : memref<16x290xf32, #tpu.memory_space<vmem>>, vector<16x256xf32>
    %cst_16 = arith.constant 0.000000e+00 : f32
    %36 = vector.shape_cast %23 : vector<1x256xi1> to vector<1x256xi1>
    %37 = vector.broadcast %36 : vector<1x256xi1> to vector<16x256xi1>
    %38 = vector.broadcast %cst_16 : f32 to vector<16x256xf32>
    %39 = arith.select %37, %35, %38 : vector<16x256xi1>, vector<16x256xf32>
    %c32 = arith.constant 32 : index
    %c0_17 = arith.constant 0 : index
    %40 = vector.load %arg9[%c32, %c0_17] : memref<144x512xf32, #tpu.memory_space<vmem>>, vector<16x256xf32>
    tpu.vector_store %arg9[%c32, %c0_17], %39 {strides = array<i32>} : memref<144x512xf32, #tpu.memory_space<vmem>>, vector<16x256xf32>,
    %c0_18 = arith.constant 0 : index
    %c16_19 = arith.constant 16 : index
    %41 = vector.load %arg8[%c0_18, %c16_19] : memref<16x290xf32, #tpu.memory_space<vmem>>, vector<16x256xf32>
    %cst_20 = arith.constant 0.000000e+00 : f32
    %42 = vector.shape_cast %21 : vector<1x256xi1> to vector<1x256xi1>
    %43 = vector.broadcast %42 : vector<1x256xi1> to vector<16x256xi1>
    %44 = vector.broadcast %cst_20 : f32 to vector<16x256xf32>
    %45 = arith.select %43, %41, %44 : vector<16x256xi1>, vector<16x256xf32>
    %c48 = arith.constant 48 : index
    %c0_21 = arith.constant 0 : index
    %46 = vector.load %arg9[%c48, %c0_21] : memref<144x512xf32, #tpu.memory_space<vmem>>, vector<16x256xf32>
    tpu.vector_store %arg9[%c48, %c0_21], %45 {strides = array<i32>} : memref<144x512xf32, #tpu.memory_space<vmem>>, vector<16x256xf32>,
    %c0_22 = arith.constant 0 : index
    %c17_23 = arith.constant 17 : index
    %47 = vector.load %arg8[%c0_22, %c17_23] : memref<16x290xf32, #tpu.memory_space<vmem>>, vector<16x256xf32>
    %c64 = arith.constant 64 : index
    %c0_24 = arith.constant 0 : index
    %48 = vector.load %arg9[%c64, %c0_24] : memref<144x512xf32, #tpu.memory_space<vmem>>, vector<16x256xf32>
    tpu.vector_store %arg9[%c64, %c0_24], %47 {strides = array<i32>} : memref<144x512xf32, #tpu.memory_space<vmem>>, vector<16x256xf32>,
    %c0_25 = arith.constant 0 : index
    %c18 = arith.constant 18 : index
    %49 = vector.load %arg8[%c0_25, %c18] : memref<16x290xf32, #tpu.memory_space<vmem>>, vector<16x256xf32>
    %cst_26 = arith.constant 0.000000e+00 : f32
    %50 = vector.shape_cast %23 : vector<1x256xi1> to vector<1x256xi1>
    %51 = vector.broadcast %50 : vector<1x256xi1> to vector<16x256xi1>
    %52 = vector.broadcast %cst_26 : f32 to vector<16x256xf32>
    %53 = arith.select %51, %49, %52 : vector<16x256xi1>, vector<16x256xf32>
    %c80 = arith.constant 80 : index
    %c0_27 = arith.constant 0 : index
    %54 = vector.load %arg9[%c80, %c0_27] : memref<144x512xf32, #tpu.memory_space<vmem>>, vector<16x256xf32>
    tpu.vector_store %arg9[%c80, %c0_27], %53 {strides = array<i32>} : memref<144x512xf32, #tpu.memory_space<vmem>>, vector<16x256xf32>,
    %c0_28 = arith.constant 0 : index
    %c32_29 = arith.constant 32 : index
    %55 = vector.load %arg8[%c0_28, %c32_29] : memref<16x290xf32, #tpu.memory_space<vmem>>, vector<16x256xf32>
    %cst_30 = arith.constant 0.000000e+00 : f32
    %56 = vector.shape_cast %21 : vector<1x256xi1> to vector<1x256xi1>
    %57 = vector.broadcast %56 : vector<1x256xi1> to vector<16x256xi1>
    %58 = vector.broadcast %cst_30 : f32 to vector<16x256xf32>
    %59 = arith.select %57, %55, %58 : vector<16x256xi1>, vector<16x256xf32>
    %c96 = arith.constant 96 : index
    %c0_31 = arith.constant 0 : index
    %60 = vector.load %arg9[%c96, %c0_31] : memref<144x512xf32, #tpu.memory_space<vmem>>, vector<16x256xf32>
    tpu.vector_store %arg9[%c96, %c0_31], %59 {strides = array<i32>} : memref<144x512xf32, #tpu.memory_space<vmem>>, vector<16x256xf32>,
    %c0_32 = arith.constant 0 : index
    %c33 = arith.constant 33 : index
    %61 = vector.load %arg8[%c0_32, %c33] : memref<16x290xf32, #tpu.memory_space<vmem>>, vector<16x256xf32>
    %c112 = arith.constant 112 : index
    %c0_33 = arith.constant 0 : index
    %62 = vector.load %arg9[%c112, %c0_33] : memref<144x512xf32, #tpu.memory_space<vmem>>, vector<16x256xf32>
    tpu.vector_store %arg9[%c112, %c0_33], %61 {strides = array<i32>} : memref<144x512xf32, #tpu.memory_space<vmem>>, vector<16x256xf32>,
    %c0_34 = arith.constant 0 : index
    %c34 = arith.constant 34 : index
    %63 = vector.load %arg8[%c0_34, %c34] : memref<16x290xf32, #tpu.memory_space<vmem>>, vector<16x256xf32>
    %cst_35 = arith.constant 0.000000e+00 : f32
    %64 = vector.shape_cast %23 : vector<1x256xi1> to vector<1x256xi1>
    %65 = vector.broadcast %64 : vector<1x256xi1> to vector<16x256xi1>
    %66 = vector.broadcast %cst_35 : f32 to vector<16x256xf32>
    %67 = arith.select %65, %63, %66 : vector<16x256xi1>, vector<16x256xf32>
    %c128 = arith.constant 128 : index
    %c0_36 = arith.constant 0 : index
    %68 = vector.load %arg9[%c128, %c0_36] : memref<144x512xf32, #tpu.memory_space<vmem>>, vector<16x256xf32>
    tpu.vector_store %arg9[%c128, %c0_36], %67 {strides = array<i32>} : memref<144x512xf32, #tpu.memory_space<vmem>>, vector<16x256xf32>,
    %c1_37 = arith.constant 1 : index
    %c0_38 = arith.constant 0 : index
    %c0_39 = arith.constant 0 : index
    %69 = vector.load %arg2[%c1_37, %c0_38, %c0_39] : memref<2x16x256xf32, #tpu.memory_space<vmem>>, vector<1x16x256xf32>
    %70 = vector.shape_cast %69 : vector<1x16x256xf32> to vector<16x256xf32>
    %c0_40 = arith.constant 0 : index
    %c17_41 = arith.constant 17 : index
    %71 = vector.load %arg8[%c0_40, %c17_41] : memref<16x290xf32, #tpu.memory_space<vmem>>, vector<16x256xf32>
    tpu.vector_store %arg8[%c0_40, %c17_41], %70 {strides = array<i32>} : memref<16x290xf32, #tpu.memory_space<vmem>>, vector<16x256xf32>,
    %c0_42 = arith.constant 0 : index
    %c0_43 = arith.constant 0 : index
    %72 = vector.load %arg8[%c0_42, %c0_43] : memref<16x290xf32, #tpu.memory_space<vmem>>, vector<16x256xf32>
    %cst_44 = arith.constant 0.000000e+00 : f32
    %73 = vector.shape_cast %21 : vector<1x256xi1> to vector<1x256xi1>
    %74 = vector.broadcast %73 : vector<1x256xi1> to vector<16x256xi1>
    %75 = vector.broadcast %cst_44 : f32 to vector<16x256xf32>
    %76 = arith.select %74, %72, %75 : vector<16x256xi1>, vector<16x256xf32>
    %c0_45 = arith.constant 0 : index
    %c256 = arith.constant 256 : index
    %77 = vector.load %arg9[%c0_45, %c256] : memref<144x512xf32, #tpu.memory_space<vmem>>, vector<16x256xf32>
    tpu.vector_store %arg9[%c0_45, %c256], %76 {strides = array<i32>} : memref<144x512xf32, #tpu.memory_space<vmem>>, vector<16x256xf32>,
    %c0_46 = arith.constant 0 : index
    %c1_47 = arith.constant 1 : index
    %78 = vector.load %arg8[%c0_46, %c1_47] : memref<16x290xf32, #tpu.memory_space<vmem>>, vector<16x256xf32>
    %c16_48 = arith.constant 16 : index
    %c256_49 = arith.constant 256 : index
    %79 = vector.load %arg9[%c16_48, %c256_49] : memref<144x512xf32, #tpu.memory_space<vmem>>, vector<16x256xf32>
    tpu.vector_store %arg9[%c16_48, %c256_49], %78 {strides = array<i32>} : memref<144x512xf32, #tpu.memory_space<vmem>>, vector<16x256xf32>,
    %c0_50 = arith.constant 0 : index
    %c2_51 = arith.constant 2 : index
    %80 = vector.load %arg8[%c0_50, %c2_51] : memref<16x290xf32, #tpu.memory_space<vmem>>, vector<16x256xf32>
    %cst_52 = arith.constant 0.000000e+00 : f32
    %81 = vector.shape_cast %23 : vector<1x256xi1> to vector<1x256xi1>
    %82 = vector.broadcast %81 : vector<1x256xi1> to vector<16x256xi1>
    %83 = vector.broadcast %cst_52 : f32 to vector<16x256xf32>
    %84 = arith.select %82, %80, %83 : vector<16x256xi1>, vector<16x256xf32>
    %c32_53 = arith.constant 32 : index
    %c256_54 = arith.constant 256 : index
    %85 = vector.load %arg9[%c32_53, %c256_54] : memref<144x512xf32, #tpu.memory_space<vmem>>, vector<16x256xf32>
    tpu.vector_store %arg9[%c32_53, %c256_54], %84 {strides = array<i32>} : memref<144x512xf32, #tpu.memory_space<vmem>>, vector<16x256xf32>,
    %c0_55 = arith.constant 0 : index
    %c16_56 = arith.constant 16 : index
    %86 = vector.load %arg8[%c0_55, %c16_56] : memref<16x290xf32, #tpu.memory_space<vmem>>, vector<16x256xf32>
    %cst_57 = arith.constant 0.000000e+00 : f32
    %87 = vector.shape_cast %21 : vector<1x256xi1> to vector<1x256xi1>
    %88 = vector.broadcast %87 : vector<1x256xi1> to vector<16x256xi1>
    %89 = vector.broadcast %cst_57 : f32 to vector<16x256xf32>
    %90 = arith.select %88, %86, %89 : vector<16x256xi1>, vector<16x256xf32>
    %c48_58 = arith.constant 48 : index
    %c256_59 = arith.constant 256 : index
    %91 = vector.load %arg9[%c48_58, %c256_59] : memref<144x512xf32, #tpu.memory_space<vmem>>, vector<16x256xf32>
    tpu.vector_store %arg9[%c48_58, %c256_59], %90 {strides = array<i32>} : memref<144x512xf32, #tpu.memory_space<vmem>>, vector<16x256xf32>,
    %c0_60 = arith.constant 0 : index
    %c17_61 = arith.constant 17 : index
    %92 = vector.load %arg8[%c0_60, %c17_61] : memref<16x290xf32, #tpu.memory_space<vmem>>, vector<16x256xf32>
    %c64_62 = arith.constant 64 : index
    %c256_63 = arith.constant 256 : index
    %93 = vector.load %arg9[%c64_62, %c256_63] : memref<144x512xf32, #tpu.memory_space<vmem>>, vector<16x256xf32>
    tpu.vector_store %arg9[%c64_62, %c256_63], %92 {strides = array<i32>} : memref<144x512xf32, #tpu.memory_space<vmem>>, vector<16x256xf32>,
    %c0_64 = arith.constant 0 : index
    %c18_65 = arith.constant 18 : index
    %94 = vector.load %arg8[%c0_64, %c18_65] : memref<16x290xf32, #tpu.memory_space<vmem>>, vector<16x256xf32>
    %cst_66 = arith.constant 0.000000e+00 : f32
    %95 = vector.shape_cast %23 : vector<1x256xi1> to vector<1x256xi1>
    %96 = vector.broadcast %95 : vector<1x256xi1> to vector<16x256xi1>
    %97 = vector.broadcast %cst_66 : f32 to vector<16x256xf32>
    %98 = arith.select %96, %94, %97 : vector<16x256xi1>, vector<16x256xf32>
    %c80_67 = arith.constant 80 : index
    %c256_68 = arith.constant 256 : index
    %99 = vector.load %arg9[%c80_67, %c256_68] : memref<144x512xf32, #tpu.memory_space<vmem>>, vector<16x256xf32>
    tpu.vector_store %arg9[%c80_67, %c256_68], %98 {strides = array<i32>} : memref<144x512xf32, #tpu.memory_space<vmem>>, vector<16x256xf32>,
    %c0_69 = arith.constant 0 : index
    %c32_70 = arith.constant 32 : index
    %100 = vector.load %arg8[%c0_69, %c32_70] : memref<16x290xf32, #tpu.memory_space<vmem>>, vector<16x256xf32>
    %cst_71 = arith.constant 0.000000e+00 : f32
    %101 = vector.shape_cast %21 : vector<1x256xi1> to vector<1x256xi1>
    %102 = vector.broadcast %101 : vector<1x256xi1> to vector<16x256xi1>
    %103 = vector.broadcast %cst_71 : f32 to vector<16x256xf32>
    %104 = arith.select %102, %100, %103 : vector<16x256xi1>, vector<16x256xf32>
    %c96_72 = arith.constant 96 : index
    %c256_73 = arith.constant 256 : index
    %105 = vector.load %arg9[%c96_72, %c256_73] : memref<144x512xf32, #tpu.memory_space<vmem>>, vector<16x256xf32>
    tpu.vector_store %arg9[%c96_72, %c256_73], %104 {strides = array<i32>} : memref<144x512xf32, #tpu.memory_space<vmem>>, vector<16x256xf32>,
    %c0_74 = arith.constant 0 : index
    %c33_75 = arith.constant 33 : index
    %106 = vector.load %arg8[%c0_74, %c33_75] : memref<16x290xf32, #tpu.memory_space<vmem>>, vector<16x256xf32>
    %c112_76 = arith.constant 112 : index
    %c256_77 = arith.constant 256 : index
    %107 = vector.load %arg9[%c112_76, %c256_77] : memref<144x512xf32, #tpu.memory_space<vmem>>, vector<16x256xf32>
    tpu.vector_store %arg9[%c112_76, %c256_77], %106 {strides = array<i32>} : memref<144x512xf32, #tpu.memory_space<vmem>>, vector<16x256xf32>,
    %c0_78 = arith.constant 0 : index
    %c34_79 = arith.constant 34 : index
    %108 = vector.load %arg8[%c0_78, %c34_79] : memref<16x290xf32, #tpu.memory_space<vmem>>, vector<16x256xf32>
    %cst_80 = arith.constant 0.000000e+00 : f32
    %109 = vector.shape_cast %23 : vector<1x256xi1> to vector<1x256xi1>
    %110 = vector.broadcast %109 : vector<1x256xi1> to vector<16x256xi1>
    %111 = vector.broadcast %cst_80 : f32 to vector<16x256xf32>
    %112 = arith.select %110, %108, %111 : vector<16x256xi1>, vector<16x256xf32>
    %c128_81 = arith.constant 128 : index
    %c256_82 = arith.constant 256 : index
    %113 = vector.load %arg9[%c128_81, %c256_82] : memref<144x512xf32, #tpu.memory_space<vmem>>, vector<16x256xf32>
    tpu.vector_store %arg9[%c128_81, %c256_82], %112 {strides = array<i32>} : memref<144x512xf32, #tpu.memory_space<vmem>>, vector<16x256xf32>,
    %c0_83 = arith.constant 0 : index
    %c0_84 = arith.constant 0 : index
    %114 = vector.load %arg3[%c0_83, %c0_84] : memref<32x144xf32, #tpu.memory_space<vmem>>, vector<32x144xf32>
    %c0_85 = arith.constant 0 : index
    %c0_86 = arith.constant 0 : index
    %115 = vector.load %arg9[%c0_85, %c0_86] : memref<144x512xf32, #tpu.memory_space<vmem>>, vector<144x512xf32>
    %cst_87 = arith.constant dense<0.000000e+00> : vector<32x512xf32>
    %116 = tpu.matmul %114, %115, %cst_87 {dimension_numbers = #tpu.dot_dimension_numbers<[1], [0], [0], [1], [0, 0, 1, 1], [], []>} : vector<32x144xf32>, vector<144x512xf32>, vector<32x512xf32> -> vector<32x512xf32>
    %c0_88 = arith.constant 0 : index
    %c0_89 = arith.constant 0 : index
    %c0_90 = arith.constant 0 : index
    %117 = vector.load %arg1[%c0_88, %c0_89, %c0_90] : memref<2x16x256xf32, #tpu.memory_space<vmem>>, vector<1x16x256xf32>
    %118 = vector.shape_cast %117 : vector<1x16x256xf32> to vector<16x256xf32>
    %c0_91 = arith.constant 0 : index
    %c17_92 = arith.constant 17 : index
    %119 = vector.load %arg8[%c0_91, %c17_92] : memref<16x290xf32, #tpu.memory_space<vmem>>, vector<16x256xf32>
    tpu.vector_store %arg8[%c0_91, %c17_92], %118 {strides = array<i32>} : memref<16x290xf32, #tpu.memory_space<vmem>>, vector<16x256xf32>,
    %c0_93 = arith.constant 0 : index
    %c0_94 = arith.constant 0 : index
    %120 = vector.load %arg8[%c0_93, %c0_94] : memref<16x290xf32, #tpu.memory_space<vmem>>, vector<16x256xf32>
    %cst_95 = arith.constant 0.000000e+00 : f32
    %121 = vector.shape_cast %21 : vector<1x256xi1> to vector<1x256xi1>
    %122 = vector.broadcast %121 : vector<1x256xi1> to vector<16x256xi1>
    %123 = vector.broadcast %cst_95 : f32 to vector<16x256xf32>
    %124 = arith.select %122, %120, %123 : vector<16x256xi1>, vector<16x256xf32>
    %c0_96 = arith.constant 0 : index
    %c0_97 = arith.constant 0 : index
    %125 = vector.load %arg9[%c0_96, %c0_97] : memref<144x512xf32, #tpu.memory_space<vmem>>, vector<16x256xf32>
    tpu.vector_store %arg9[%c0_96, %c0_97], %124 {strides = array<i32>} : memref<144x512xf32, #tpu.memory_space<vmem>>, vector<16x256xf32>,
    %c0_98 = arith.constant 0 : index
    %c1_99 = arith.constant 1 : index
    %126 = vector.load %arg8[%c0_98, %c1_99] : memref<16x290xf32, #tpu.memory_space<vmem>>, vector<16x256xf32>
    %c16_100 = arith.constant 16 : index
    %c0_101 = arith.constant 0 : index
    %127 = vector.load %arg9[%c16_100, %c0_101] : memref<144x512xf32, #tpu.memory_space<vmem>>, vector<16x256xf32>
    tpu.vector_store %arg9[%c16_100, %c0_101], %126 {strides = array<i32>} : memref<144x512xf32, #tpu.memory_space<vmem>>, vector<16x256xf32>,
    %c0_102 = arith.constant 0 : index
    %c2_103 = arith.constant 2 : index
    %128 = vector.load %arg8[%c0_102, %c2_103] : memref<16x290xf32, #tpu.memory_space<vmem>>, vector<16x256xf32>
    %cst_104 = arith.constant 0.000000e+00 : f32
    %129 = vector.shape_cast %23 : vector<1x256xi1> to vector<1x256xi1>
    %130 = vector.broadcast %129 : vector<1x256xi1> to vector<16x256xi1>
    %131 = vector.broadcast %cst_104 : f32 to vector<16x256xf32>
    %132 = arith.select %130, %128, %131 : vector<16x256xi1>, vector<16x256xf32>
    %c32_105 = arith.constant 32 : index
    %c0_106 = arith.constant 0 : index
    %133 = vector.load %arg9[%c32_105, %c0_106] : memref<144x512xf32, #tpu.memory_space<vmem>>, vector<16x256xf32>
    tpu.vector_store %arg9[%c32_105, %c0_106], %132 {strides = array<i32>} : memref<144x512xf32, #tpu.memory_space<vmem>>, vector<16x256xf32>,
    %c0_107 = arith.constant 0 : index
    %c16_108 = arith.constant 16 : index
    %134 = vector.load %arg8[%c0_107, %c16_108] : memref<16x290xf32, #tpu.memory_space<vmem>>, vector<16x256xf32>
    %cst_109 = arith.constant 0.000000e+00 : f32
    %135 = vector.shape_cast %21 : vector<1x256xi1> to vector<1x256xi1>
    %136 = vector.broadcast %135 : vector<1x256xi1> to vector<16x256xi1>
    %137 = vector.broadcast %cst_109 : f32 to vector<16x256xf32>
    %138 = arith.select %136, %134, %137 : vector<16x256xi1>, vector<16x256xf32>
    %c48_110 = arith.constant 48 : index
    %c0_111 = arith.constant 0 : index
    %139 = vector.load %arg9[%c48_110, %c0_111] : memref<144x512xf32, #tpu.memory_space<vmem>>, vector<16x256xf32>
    tpu.vector_store %arg9[%c48_110, %c0_111], %138 {strides = array<i32>} : memref<144x512xf32, #tpu.memory_space<vmem>>, vector<16x256xf32>,
    %c0_112 = arith.constant 0 : index
    %c17_113 = arith.constant 17 : index
    %140 = vector.load %arg8[%c0_112, %c17_113] : memref<16x290xf32, #tpu.memory_space<vmem>>, vector<16x256xf32>
    %c64_114 = arith.constant 64 : index
    %c0_115 = arith.constant 0 : index
    %141 = vector.load %arg9[%c64_114, %c0_115] : memref<144x512xf32, #tpu.memory_space<vmem>>, vector<16x256xf32>
    tpu.vector_store %arg9[%c64_114, %c0_115], %140 {strides = array<i32>} : memref<144x512xf32, #tpu.memory_space<vmem>>, vector<16x256xf32>,
    %c0_116 = arith.constant 0 : index
    %c18_117 = arith.constant 18 : index
    %142 = vector.load %arg8[%c0_116, %c18_117] : memref<16x290xf32, #tpu.memory_space<vmem>>, vector<16x256xf32>
    %cst_118 = arith.constant 0.000000e+00 : f32
    %143 = vector.shape_cast %23 : vector<1x256xi1> to vector<1x256xi1>
    %144 = vector.broadcast %143 : vector<1x256xi1> to vector<16x256xi1>
    %145 = vector.broadcast %cst_118 : f32 to vector<16x256xf32>
    %146 = arith.select %144, %142, %145 : vector<16x256xi1>, vector<16x256xf32>
    %c80_119 = arith.constant 80 : index
    %c0_120 = arith.constant 0 : index
    %147 = vector.load %arg9[%c80_119, %c0_120] : memref<144x512xf32, #tpu.memory_space<vmem>>, vector<16x256xf32>
    tpu.vector_store %arg9[%c80_119, %c0_120], %146 {strides = array<i32>} : memref<144x512xf32, #tpu.memory_space<vmem>>, vector<16x256xf32>,
    %c0_121 = arith.constant 0 : index
    %c32_122 = arith.constant 32 : index
    %148 = vector.load %arg8[%c0_121, %c32_122] : memref<16x290xf32, #tpu.memory_space<vmem>>, vector<16x256xf32>
    %cst_123 = arith.constant 0.000000e+00 : f32
    %149 = vector.shape_cast %21 : vector<1x256xi1> to vector<1x256xi1>
    %150 = vector.broadcast %149 : vector<1x256xi1> to vector<16x256xi1>
    %151 = vector.broadcast %cst_123 : f32 to vector<16x256xf32>
    %152 = arith.select %150, %148, %151 : vector<16x256xi1>, vector<16x256xf32>
    %c96_124 = arith.constant 96 : index
    %c0_125 = arith.constant 0 : index
    %153 = vector.load %arg9[%c96_124, %c0_125] : memref<144x512xf32, #tpu.memory_space<vmem>>, vector<16x256xf32>
    tpu.vector_store %arg9[%c96_124, %c0_125], %152 {strides = array<i32>} : memref<144x512xf32, #tpu.memory_space<vmem>>, vector<16x256xf32>,
    %c0_126 = arith.constant 0 : index
    %c33_127 = arith.constant 33 : index
    %154 = vector.load %arg8[%c0_126, %c33_127] : memref<16x290xf32, #tpu.memory_space<vmem>>, vector<16x256xf32>
    %c112_128 = arith.constant 112 : index
    %c0_129 = arith.constant 0 : index
    %155 = vector.load %arg9[%c112_128, %c0_129] : memref<144x512xf32, #tpu.memory_space<vmem>>, vector<16x256xf32>
    tpu.vector_store %arg9[%c112_128, %c0_129], %154 {strides = array<i32>} : memref<144x512xf32, #tpu.memory_space<vmem>>, vector<16x256xf32>,
    %c0_130 = arith.constant 0 : index
    %c34_131 = arith.constant 34 : index
    %156 = vector.load %arg8[%c0_130, %c34_131] : memref<16x290xf32, #tpu.memory_space<vmem>>, vector<16x256xf32>
    %cst_132 = arith.constant 0.000000e+00 : f32
    %157 = vector.shape_cast %23 : vector<1x256xi1> to vector<1x256xi1>
    %158 = vector.broadcast %157 : vector<1x256xi1> to vector<16x256xi1>
    %159 = vector.broadcast %cst_132 : f32 to vector<16x256xf32>
    %160 = arith.select %158, %156, %159 : vector<16x256xi1>, vector<16x256xf32>
    %c128_133 = arith.constant 128 : index
    %c0_134 = arith.constant 0 : index
    %161 = vector.load %arg9[%c128_133, %c0_134] : memref<144x512xf32, #tpu.memory_space<vmem>>, vector<16x256xf32>
    tpu.vector_store %arg9[%c128_133, %c0_134], %160 {strides = array<i32>} : memref<144x512xf32, #tpu.memory_space<vmem>>, vector<16x256xf32>,
    %c1_135 = arith.constant 1 : index
    %c0_136 = arith.constant 0 : index
    %c0_137 = arith.constant 0 : index
    %162 = vector.load %arg1[%c1_135, %c0_136, %c0_137] : memref<2x16x256xf32, #tpu.memory_space<vmem>>, vector<1x16x256xf32>
    %163 = vector.shape_cast %162 : vector<1x16x256xf32> to vector<16x256xf32>
    %c0_138 = arith.constant 0 : index
    %c17_139 = arith.constant 17 : index
    %164 = vector.load %arg8[%c0_138, %c17_139] : memref<16x290xf32, #tpu.memory_space<vmem>>, vector<16x256xf32>
    tpu.vector_store %arg8[%c0_138, %c17_139], %163 {strides = array<i32>} : memref<16x290xf32, #tpu.memory_space<vmem>>, vector<16x256xf32>,
    %c0_140 = arith.constant 0 : index
    %c0_141 = arith.constant 0 : index
    %165 = vector.load %arg8[%c0_140, %c0_141] : memref<16x290xf32, #tpu.memory_space<vmem>>, vector<16x256xf32>
    %cst_142 = arith.constant 0.000000e+00 : f32
    %166 = vector.shape_cast %21 : vector<1x256xi1> to vector<1x256xi1>
    %167 = vector.broadcast %166 : vector<1x256xi1> to vector<16x256xi1>
    %168 = vector.broadcast %cst_142 : f32 to vector<16x256xf32>
    %169 = arith.select %167, %165, %168 : vector<16x256xi1>, vector<16x256xf32>
    %c0_143 = arith.constant 0 : index
    %c256_144 = arith.constant 256 : index
    %170 = vector.load %arg9[%c0_143, %c256_144] : memref<144x512xf32, #tpu.memory_space<vmem>>, vector<16x256xf32>
    tpu.vector_store %arg9[%c0_143, %c256_144], %169 {strides = array<i32>} : memref<144x512xf32, #tpu.memory_space<vmem>>, vector<16x256xf32>,
    %c0_145 = arith.constant 0 : index
    %c1_146 = arith.constant 1 : index
    %171 = vector.load %arg8[%c0_145, %c1_146] : memref<16x290xf32, #tpu.memory_space<vmem>>, vector<16x256xf32>
    %c16_147 = arith.constant 16 : index
    %c256_148 = arith.constant 256 : index
    %172 = vector.load %arg9[%c16_147, %c256_148] : memref<144x512xf32, #tpu.memory_space<vmem>>, vector<16x256xf32>
    tpu.vector_store %arg9[%c16_147, %c256_148], %171 {strides = array<i32>} : memref<144x512xf32, #tpu.memory_space<vmem>>, vector<16x256xf32>,
    %c0_149 = arith.constant 0 : index
    %c2_150 = arith.constant 2 : index
    %173 = vector.load %arg8[%c0_149, %c2_150] : memref<16x290xf32, #tpu.memory_space<vmem>>, vector<16x256xf32>
    %cst_151 = arith.constant 0.000000e+00 : f32
    %174 = vector.shape_cast %23 : vector<1x256xi1> to vector<1x256xi1>
    %175 = vector.broadcast %174 : vector<1x256xi1> to vector<16x256xi1>
    %176 = vector.broadcast %cst_151 : f32 to vector<16x256xf32>
    %177 = arith.select %175, %173, %176 : vector<16x256xi1>, vector<16x256xf32>
    %c32_152 = arith.constant 32 : index
    %c256_153 = arith.constant 256 : index
    %178 = vector.load %arg9[%c32_152, %c256_153] : memref<144x512xf32, #tpu.memory_space<vmem>>, vector<16x256xf32>
    tpu.vector_store %arg9[%c32_152, %c256_153], %177 {strides = array<i32>} : memref<144x512xf32, #tpu.memory_space<vmem>>, vector<16x256xf32>,
    %c0_154 = arith.constant 0 : index
    %c16_155 = arith.constant 16 : index
    %179 = vector.load %arg8[%c0_154, %c16_155] : memref<16x290xf32, #tpu.memory_space<vmem>>, vector<16x256xf32>
    %cst_156 = arith.constant 0.000000e+00 : f32
    %180 = vector.shape_cast %21 : vector<1x256xi1> to vector<1x256xi1>
    %181 = vector.broadcast %180 : vector<1x256xi1> to vector<16x256xi1>
    %182 = vector.broadcast %cst_156 : f32 to vector<16x256xf32>
    %183 = arith.select %181, %179, %182 : vector<16x256xi1>, vector<16x256xf32>
    %c48_157 = arith.constant 48 : index
    %c256_158 = arith.constant 256 : index
    %184 = vector.load %arg9[%c48_157, %c256_158] : memref<144x512xf32, #tpu.memory_space<vmem>>, vector<16x256xf32>
    tpu.vector_store %arg9[%c48_157, %c256_158], %183 {strides = array<i32>} : memref<144x512xf32, #tpu.memory_space<vmem>>, vector<16x256xf32>,
    %c0_159 = arith.constant 0 : index
    %c17_160 = arith.constant 17 : index
    %185 = vector.load %arg8[%c0_159, %c17_160] : memref<16x290xf32, #tpu.memory_space<vmem>>, vector<16x256xf32>
    %c64_161 = arith.constant 64 : index
    %c256_162 = arith.constant 256 : index
    %186 = vector.load %arg9[%c64_161, %c256_162] : memref<144x512xf32, #tpu.memory_space<vmem>>, vector<16x256xf32>
    tpu.vector_store %arg9[%c64_161, %c256_162], %185 {strides = array<i32>} : memref<144x512xf32, #tpu.memory_space<vmem>>, vector<16x256xf32>,
    %c0_163 = arith.constant 0 : index
    %c18_164 = arith.constant 18 : index
    %187 = vector.load %arg8[%c0_163, %c18_164] : memref<16x290xf32, #tpu.memory_space<vmem>>, vector<16x256xf32>
    %cst_165 = arith.constant 0.000000e+00 : f32
    %188 = vector.shape_cast %23 : vector<1x256xi1> to vector<1x256xi1>
    %189 = vector.broadcast %188 : vector<1x256xi1> to vector<16x256xi1>
    %190 = vector.broadcast %cst_165 : f32 to vector<16x256xf32>
    %191 = arith.select %189, %187, %190 : vector<16x256xi1>, vector<16x256xf32>
    %c80_166 = arith.constant 80 : index
    %c256_167 = arith.constant 256 : index
    %192 = vector.load %arg9[%c80_166, %c256_167] : memref<144x512xf32, #tpu.memory_space<vmem>>, vector<16x256xf32>
    tpu.vector_store %arg9[%c80_166, %c256_167], %191 {strides = array<i32>} : memref<144x512xf32, #tpu.memory_space<vmem>>, vector<16x256xf32>,
    %c0_168 = arith.constant 0 : index
    %c32_169 = arith.constant 32 : index
    %193 = vector.load %arg8[%c0_168, %c32_169] : memref<16x290xf32, #tpu.memory_space<vmem>>, vector<16x256xf32>
    %cst_170 = arith.constant 0.000000e+00 : f32
    %194 = vector.shape_cast %21 : vector<1x256xi1> to vector<1x256xi1>
    %195 = vector.broadcast %194 : vector<1x256xi1> to vector<16x256xi1>
    %196 = vector.broadcast %cst_170 : f32 to vector<16x256xf32>
    %197 = arith.select %195, %193, %196 : vector<16x256xi1>, vector<16x256xf32>
    %c96_171 = arith.constant 96 : index
    %c256_172 = arith.constant 256 : index
    %198 = vector.load %arg9[%c96_171, %c256_172] : memref<144x512xf32, #tpu.memory_space<vmem>>, vector<16x256xf32>
    tpu.vector_store %arg9[%c96_171, %c256_172], %197 {strides = array<i32>} : memref<144x512xf32, #tpu.memory_space<vmem>>, vector<16x256xf32>,
    %c0_173 = arith.constant 0 : index
    %c33_174 = arith.constant 33 : index
    %199 = vector.load %arg8[%c0_173, %c33_174] : memref<16x290xf32, #tpu.memory_space<vmem>>, vector<16x256xf32>
    %c112_175 = arith.constant 112 : index
    %c256_176 = arith.constant 256 : index
    %200 = vector.load %arg9[%c112_175, %c256_176] : memref<144x512xf32, #tpu.memory_space<vmem>>, vector<16x256xf32>
    tpu.vector_store %arg9[%c112_175, %c256_176], %199 {strides = array<i32>} : memref<144x512xf32, #tpu.memory_space<vmem>>, vector<16x256xf32>,
    %c0_177 = arith.constant 0 : index
    %c34_178 = arith.constant 34 : index
    %201 = vector.load %arg8[%c0_177, %c34_178] : memref<16x290xf32, #tpu.memory_space<vmem>>, vector<16x256xf32>
    %cst_179 = arith.constant 0.000000e+00 : f32
    %202 = vector.shape_cast %23 : vector<1x256xi1> to vector<1x256xi1>
    %203 = vector.broadcast %202 : vector<1x256xi1> to vector<16x256xi1>
    %204 = vector.broadcast %cst_179 : f32 to vector<16x256xf32>
    %205 = arith.select %203, %201, %204 : vector<16x256xi1>, vector<16x256xf32>
    %c128_180 = arith.constant 128 : index
    %c256_181 = arith.constant 256 : index
    %206 = vector.load %arg9[%c128_180, %c256_181] : memref<144x512xf32, #tpu.memory_space<vmem>>, vector<16x256xf32>
    tpu.vector_store %arg9[%c128_180, %c256_181], %205 {strides = array<i32>} : memref<144x512xf32, #tpu.memory_space<vmem>>, vector<16x256xf32>,
    %c0_182 = arith.constant 0 : index
    %c0_183 = arith.constant 0 : index
    %207 = vector.load %arg5[%c0_182, %c0_183] : memref<16x144xf32, #tpu.memory_space<vmem>>, vector<16x144xf32>
    %c0_184 = arith.constant 0 : index
    %c0_185 = arith.constant 0 : index
    %208 = vector.load %arg9[%c0_184, %c0_185] : memref<144x512xf32, #tpu.memory_space<vmem>>, vector<144x512xf32>
    %cst_186 = arith.constant dense<0.000000e+00> : vector<16x512xf32>
    %209 = tpu.matmul %207, %208, %cst_186 {dimension_numbers = #tpu.dot_dimension_numbers<[1], [0], [0], [1], [0, 0, 1, 1], [], []>} : vector<16x144xf32>, vector<144x512xf32>, vector<16x512xf32> -> vector<16x512xf32>
    %c0_187 = arith.constant 0 : index
    %c0_188 = arith.constant 0 : index
    %210 = vector.load %arg6[%c0_187, %c0_188] : memref<16x1xf32, #tpu.memory_space<vmem>>, vector<16x1xf32>
    %211 = vector.broadcast %210 : vector<16x1xf32> to vector<16x512xf32>
    %212 = arith.addf %209, %211 : vector<16x512xf32>
    %213 = vector.extract_strided_slice %116 {offsets = [0, 0], sizes = [16, 512], strides = [1, 1]} : vector<32x512xf32> to vector<16x512xf32>
    %c0_189 = arith.constant 0 : index
    %c0_190 = arith.constant 0 : index
    %214 = vector.load %arg4[%c0_189, %c0_190] : memref<16x1xf32, #tpu.memory_space<vmem>>, vector<16x1xf32>
    %215 = vector.broadcast %214 : vector<16x1xf32> to vector<16x512xf32>
    %216 = arith.addf %213, %215 : vector<16x512xf32>
    %217 = vector.extract_strided_slice %116 {offsets = [16, 0], sizes = [16, 512], strides = [1, 1]} : vector<32x512xf32> to vector<16x512xf32>
    %c0_191 = arith.constant 0 : index
    %c0_192 = arith.constant 0 : index
    %c0_193 = arith.constant 0 : index
    %218 = vector.load %arg1[%c0_191, %c0_192, %c0_193] : memref<2x16x256xf32, #tpu.memory_space<vmem>>, vector<1x16x256xf32>
    %219 = vector.shape_cast %218 : vector<1x16x256xf32> to vector<16x256xf32>
    %220 = vector.extract_strided_slice %216 {offsets = [0, 0], sizes = [16, 256], strides = [1, 1]} : vector<16x512xf32> to vector<16x256xf32>
    %221 = arith.addf %219, %220 : vector<16x256xf32>
    %cst_194 = arith.constant 0.000000e+00 : f32
    %222 = vector.broadcast %cst_194 : f32 to vector<16x256xf32>
    %223 = arith.maximumf %221, %222 : vector<16x256xf32>
    %224 = vector.extract_strided_slice %212 {offsets = [0, 0], sizes = [16, 256], strides = [1, 1]} : vector<16x512xf32> to vector<16x256xf32>
    %225 = arith.addf %223, %224 : vector<16x256xf32>
    %cst_195 = arith.constant 0.000000e+00 : f32
    %226 = vector.broadcast %cst_195 : f32 to vector<16x256xf32>
    %227 = arith.maximumf %225, %226 : vector<16x256xf32>
    %228 = vector.extract_strided_slice %217 {offsets = [0, 0], sizes = [16, 256], strides = [1, 1]} : vector<16x512xf32> to vector<16x256xf32>
    %229 = arith.addf %227, %228 : vector<16x256xf32>
    %230 = arith.negf %229 : vector<16x256xf32>
    %231 = math.exp %230 : vector<16x256xf32>
    %cst_196 = arith.constant 1.000000e+00 : f32
    %232 = vector.broadcast %cst_196 : f32 to vector<16x256xf32>
    %233 = arith.addf %232, %231 : vector<16x256xf32>
    %234 = arith.divf %232, %233 : vector<16x256xf32>
    %c0_197 = arith.constant 0 : index
    %c0_198 = arith.constant 0 : index
    %c0_199 = arith.constant 0 : index
    %235 = vector.load %arg7[%c0_197, %c0_198, %c0_199] : memref<2x16x256xf32, #tpu.memory_space<vmem>>, vector<1x16x256xf32>
    %236 = vector.shape_cast %235 : vector<1x16x256xf32> to vector<16x256xf32>
    %237 = vector.shape_cast %234 : vector<16x256xf32> to vector<1x16x256xf32>
    tpu.vector_store %arg7[%c0_197, %c0_198, %c0_199], %237 {strides = array<i32>} : memref<2x16x256xf32, #tpu.memory_space<vmem>>, vector<1x16x256xf32>,
    %c1_200 = arith.constant 1 : index
    %c0_201 = arith.constant 0 : index
    %c0_202 = arith.constant 0 : index
    %238 = vector.load %arg1[%c1_200, %c0_201, %c0_202] : memref<2x16x256xf32, #tpu.memory_space<vmem>>, vector<1x16x256xf32>
    %239 = vector.shape_cast %238 : vector<1x16x256xf32> to vector<16x256xf32>
    %240 = vector.extract_strided_slice %216 {offsets = [0, 256], sizes = [16, 256], strides = [1, 1]} : vector<16x512xf32> to vector<16x256xf32>
    %241 = arith.addf %239, %240 : vector<16x256xf32>
    %cst_203 = arith.constant 0.000000e+00 : f32
    %242 = vector.broadcast %cst_203 : f32 to vector<16x256xf32>
    %243 = arith.maximumf %241, %242 : vector<16x256xf32>
    %244 = vector.extract_strided_slice %212 {offsets = [0, 256], sizes = [16, 256], strides = [1, 1]} : vector<16x512xf32> to vector<16x256xf32>
    %245 = arith.addf %243, %244 : vector<16x256xf32>
    %cst_204 = arith.constant 0.000000e+00 : f32
    %246 = vector.broadcast %cst_204 : f32 to vector<16x256xf32>
    %247 = arith.maximumf %245, %246 : vector<16x256xf32>
    %248 = vector.extract_strided_slice %217 {offsets = [0, 256], sizes = [16, 256], strides = [1, 1]} : vector<16x512xf32> to vector<16x256xf32>
    %249 = arith.addf %247, %248 : vector<16x256xf32>
    %250 = arith.negf %249 : vector<16x256xf32>
    %251 = math.exp %250 : vector<16x256xf32>
    %cst_205 = arith.constant 1.000000e+00 : f32
    %252 = vector.broadcast %cst_205 : f32 to vector<16x256xf32>
    %253 = arith.addf %252, %251 : vector<16x256xf32>
    %254 = arith.divf %252, %253 : vector<16x256xf32>
    %c1_206 = arith.constant 1 : index
    %c0_207 = arith.constant 0 : index
    %c0_208 = arith.constant 0 : index
    %255 = vector.load %arg7[%c1_206, %c0_207, %c0_208] : memref<2x16x256xf32, #tpu.memory_space<vmem>>, vector<1x16x256xf32>
    %256 = vector.shape_cast %255 : vector<1x16x256xf32> to vector<16x256xf32>
    %257 = vector.shape_cast %254 : vector<16x256xf32> to vector<1x16x256xf32>
    tpu.vector_store %arg7[%c1_206, %c0_207, %c0_208], %257 {strides = array<i32>} : memref<2x16x256xf32, #tpu.memory_space<vmem>>, vector<1x16x256xf32>,
    return
  }
  func.func @transform_0(%arg0: i32) -> (i32, i32, i32) {
    %c0_i32 = arith.constant 0 : i32
    %c0_i32_0 = arith.constant 0 : i32
    %c0_i32_1 = arith.constant 0 : i32
    return %arg0, %c0_i32, %c0_i32_0 : i32, i32, i32
  }
  func.func @transform_1(%arg0: i32) -> (i32, i32, i32) {
    %c0_i32 = arith.constant 0 : i32
    %c0_i32_0 = arith.constant 0 : i32
    %c0_i32_1 = arith.constant 0 : i32
    return %arg0, %c0_i32, %c0_i32_0 : i32, i32, i32
  }
  func.func @transform_2(%arg0: i32) -> (i32, i32) {
    %c0_i32 = arith.constant 0 : i32
    %c0_i32_0 = arith.constant 0 : i32
    %c0_i32_1 = arith.constant 0 : i32
    return %c0_i32, %c0_i32_0 : i32, i32
  }
  func.func @transform_3(%arg0: i32) -> (i32, i32) {
    %c0_i32 = arith.constant 0 : i32
    %c0_i32_0 = arith.constant 0 : i32
    %c0_i32_1 = arith.constant 0 : i32
    return %c0_i32, %c0_i32_0 : i32, i32
  }
  func.func @transform_4(%arg0: i32) -> (i32, i32) {
    %c0_i32 = arith.constant 0 : i32
    %c0_i32_0 = arith.constant 0 : i32
    %c0_i32_1 = arith.constant 0 : i32
    return %c0_i32, %c0_i32_0 : i32, i32
  }
  func.func @transform_5(%arg0: i32) -> (i32, i32) {
    %c0_i32 = arith.constant 0 : i32
    %c0_i32_0 = arith.constant 0 : i32
    %c0_i32_1 = arith.constant 0 : i32
    return %c0_i32, %c0_i32_0 : i32, i32
  }
  func.func @transform_6(%arg0: i32) -> (i32, i32, i32) {
    %c0_i32 = arith.constant 0 : i32
    %c0_i32_0 = arith.constant 0 : i32
    %c0_i32_1 = arith.constant 0 : i32
    return %arg0, %c0_i32, %c0_i32_0 : i32, i32, i32
  }
}

</mosaic_0001>

<bundles_post_ra>
// kernel: tpu_custom_call.1
= control target key start
LH: loop header
LB: loop body
LE: loop exit
PB: predicated region body
PF: predicated region fallthrough
CT: control target
= control target key end

     0   :  { %s4698_s0 = inlined_call_operand.hbm [shape: f32[4,16,256], index: 0, kind: input, shape index: {}]   ;;  %s4699_s1 = inlined_call_operand.hbm [shape: f32[4,16,256], index: 1, kind: input, shape index: {}]   ;;  %s4700_s2 = inlined_call_operand.hbm [shape: f32[32,144], index: 2, kind: input, shape index: {}]   ;;  %s4701_s3 = inlined_call_operand.vmem [shape: f32[16,1], index: 3, kind: input, shape index: {}]   ;;  %s4702_s4 = inlined_call_operand.vmem [shape: f32[16,144], index: 4, kind: input, shape index: {}]   ;;  %s4703_s5 = inlined_call_operand.vmem [shape: f32[16,1], index: 5, kind: input, shape index: {}]   ;;  %s4704_s6 = inlined_call_operand.hbm [shape: f32[4,16,256], index: 6, kind: output, shape index: {}]  }
   0x1   :  { %4715 = sst [smem:[#allocation18_spill]] %s4698_s0 }
   0x2   :  { %4716 = sst [smem:[#allocation19_spill]] %s4700_s2 }
   0x3   :  { %11 = vsyncpa [#allocation5], 0 }
   0x4   :  { %13 = vsyncpa [#allocation5 + $0x1], 0 }
   0x5   :  { %14 = vsyncpa [#allocation8], 0 }
   0x6   :  { %16 = vsyncpa [#allocation8 + $0x1], 0 }
   0x7   :  { %17 = vsyncpa [#allocation6], 0 }
   0x8   :  { %19 = vsyncpa [#allocation6 + $0x1], 0  ;;  %s3717_s21 = smov 0   ;;  %s3719_s22 = smov 0  }
   0x9   :  { %s3721_s23 = smov 0   ;;  %s3723_s24 = smov 0  }
   0xa LB: > { %4717 = sst [smem:[#allocation15_spill]] %s3657_s23  ;;  %s3738_s25 = sadd.s32 4294967295, %s3661_s24   ;;  %s3661_s24 = sphi %s3723_s24, %s4750_s24   ;;  %s3657_s23 = sphi %s3721_s23, %s4752_s23   ;;  %s3653_s22 = sphi %s3719_s22, %s4754_s22   ;;  %s3649_s21 = sphi %s3717_s21, %s4753_s21  }
   0xb   : > { %s2554_s26 = sadd.s32 4294967294, %s3661_s24   ;;  %p45_p0 = scmp.ne.s32.totalorder %s3653_s22, %s3649_s21 }
   0xc   : > { %p4705_p1 = scmp.eq.s32.totalorder %s3738_s25, 0  ;;  %p185_p3 = scmp.eq.s32.totalorder %s2554_s26, 1 }
   0xd   : > { %p2555_p5 = scmp.ge.s32.totalorder %s3661_s24, 1  ;;  %p192_p7 = scmp.lt.s32.totalorder %s3661_s24, 3 }
   0xe   : > { %p3747_p4 = por %p4705_p1, %p45_p0  ;;  %p3752_p6 = por %p185_p3, %p45_p0 }
   0xf   : > { %p3758_p9 = pnand %p2555_p5, %p192_p7  ;;  %s3663_s30 = smov [#allocation9]  }
  0x10   : > { %s4718_s27 = scalar_select %p3747_p4, 1, 0 }
  0x11   : > { %s4719_s28 = scalar_select %p3752_p6, 1, 0 }
  0x12   : > { %s4720_s29 = scalar_select %p3758_p9, 1, 0 }
  0x13   : > { %s204_s7 = sshll.u32 %s3663_s30, 4  ;;  %p2918_p10 = pneg %p3758_p9  ;;  %s3762_s7 = int_to_ptr.vmem [resolvable:$true] %s204_s7 }
  0x14   : > { %s3774_s9 = sadd.s32 1, %s3661_s24   ;;  %s32_s10 = sadd.s32 1, %s3657_s23 }
  0x15   : > { %p3769_p12 = pnand %p2918_p10, %p4705_p1  ;;  %4722 = sst [smem:[#allocation16_spill]] %s3774_s9 }
  0x16   : > { %s29_s11 = ssub.s32 %s3661_s24, %s3774_s9  ;;  %s4723_s2 = sld [smem:[#allocation19_spill]] }
  0x17   : > { %p3501_p0 = pneg %p3769_p12 }
  0x1c   : > { %s3499_s14 = scalar_lea.hbm %s4723_s2, 1024 }
  0x1d   : > { %p3500_p13 = scmp.ne.s32.totalorder %s4723_s2, %s3499_s14  ;;  %p3506_p7 = scmp.lt.u32.totalorder %s3499_s14, %s4723_s2 }
  0x1f   : > { %p3502_p3 = pnand %p3501_p0, %p3500_p13 }
  0x21   : > { %p3503_p5 = pneg %p3502_p3 }
  0x23   : > { %p3508_p10 = pnand %p3506_p7, %p3503_p5 }
  0x25   : > { %3511 = shalt.err (!%p3508_p10)
}
  0x26   : > { %s3512_s19 = scalar_lea.vmem %s3762_s7, 1024  ;;  %p3520_p2 = scmp.lt.s32.totalorder %s3762_s7, %s3762_s7 }
  0x27   : > { %p3513_p11 = scmp.ne.s32.totalorder %s3762_s7, %s3512_s19  ;;  %p3521_p6 = scmp.lt.s32.totalorder %s3512_s19, %s3512_s19 }
  0x29   : > { %p3515_p8 = pnand %p3513_p11, %p3501_p0  ;;  %p3522_p4 = por %p3521_p6, %p3520_p2 }
  0x2b   : > { %p3516_p1 = pneg %p3515_p8 }
  0x2d   : > { %p3523_p9 = pnand %p3522_p4, %p3516_p1 }
  0x2f   : > { %3526 = shalt.err (!%p3523_p9)
}
  0x30   : > { %s4708_s20 = smov 256   ;;  %s4710_s26 = smov 16  }
  0x31   : > { %2921 = dma.hbm_to_vmem [thread:$0]  (!%p3769_p12), %s4723_s2, 1024, %s3762_s7, [#allocation8], %s4708_s20, %s4708_s20, %s4710_s26  }
  0x32   : > { %p30_p1 = scmp.eq.s32.totalorder %s29_s11, 0  ;;  %p39_p2 = scmp.ne.s32.totalorder %s3657_s23, %s3653_s22 }
  0x33   : > { %p40_p4 = scmp.eq.s32.totalorder %s3661_s24, 0  ;;  %p2934_p6 = scmp.lt.s32.totalorder %s3661_s24, 2 }
  0x34   : > { %s3808_s13 = scalar_select %p30_p1, %s3657_s23, %s32_s10  }
  0x35   : > { %p41_p8 = por %p40_p4, %p39_p2  ;;  %p4725_p9 = scmp.eq.s32.totalorder %s3738_s25, 1 }
  0x36   : > { %4724 = sst [smem:[#allocation17_spill]] %s3808_s13  ;;  %s227_s8 = sand.u32 1, %s3657_s23  }
  0x37   : > { %p3812_p11 = por %p4725_p9, %p39_p2  ;;  %s2615_s15 = sshll.u32 %s3661_s24, 10 }
  0x38   : > { %s3818_s16 = sshll.u32 %s227_s8, 6  ;;  %s4727_s0 = sld [smem:[#allocation18_spill]] }
  0x39   : > { %s231_s10 = scalar_lea.vmem [#allocation4], %s3818_s16  ;;  %p3826_p12 = pnand %p2934_p6, %p41_p8 }
  0x3a   : > { %s239_s11 = sshll.u32 %s231_s10, 4  ;;  %s3835_s17 = scalar_lea.hbm %s4699_s1, %s2615_s15  ;;  %s3830_s11 = int_to_ptr.vmem [resolvable:$true] %s239_s11 }
  0x3b   : > { %s3837_s18 = scalar_lea.sflag [#allocation5], %s227_s8  ;;  %p3529_p0 = pneg %p3826_p12 }
  0x3e   : > { %s3823_s7 = scalar_lea.hbm %s4727_s0, %s2615_s15  ;;  %s3532_s2 = scalar_lea.hbm %s4727_s0, 2048 }
  0x3f   : > { %s3527_s20 = scalar_lea.hbm %s3823_s7, 1024  ;;  %p3533_p7 = scmp.lt.u32.totalorder %s3823_s7, %s4727_s0 }
  0x40   : > { %p3528_p13 = scmp.ne.s32.totalorder %s3823_s7, %s3527_s20  ;;  %p3534_p10 = scmp.lt.u32.totalorder %s3532_s2, %s3527_s20 }
  0x41   : > { %p3536_p2 = scmp.lt.u32.totalorder %s3527_s20, %s3823_s7 }
  0x42   : > { %p3530_p3 = pnand %p3529_p0, %p3528_p13  ;;  %p3535_p1 = por %p3534_p10, %p3533_p7 }
  0x44   : > { %p3531_p5 = pneg %p3530_p3  ;;  %p3537_p4 = por %p3536_p2, %p3535_p1 }
  0x46   : > { %p3538_p6 = pnand %p3537_p4, %p3531_p5 }
  0x48   : > { %3541 = shalt.err (!%p3538_p6)
}
  0x49   : > { %s3542_s8 = scalar_lea.vmem %s3830_s11, 1024  ;;  %s3666_s26 = smov [#allocation4]  }
  0x4a   : > { %p3543_p8 = scmp.ne.s32.totalorder %s3830_s11, %s3542_s8  ;;  %s3547_s15 = sshll.u32 %s3666_s26, 4  ;;  %s3548_s15 = int_to_ptr.vmem [resolvable:$false] %s3547_s15 }
  0x4b   : > { %s3549_s23 = scalar_lea.vmem %s3548_s15, 2048  ;;  %p3550_p3 = scmp.lt.s32.totalorder %s3830_s11, %s3548_s15 }
  0x4c   : > { %p3545_p9 = pnand %p3543_p8, %p3529_p0  ;;  %p3551_p7 = scmp.lt.s32.totalorder %s3549_s23, %s3542_s8 }
  0x4e   : > { %p3546_p13 = pneg %p3545_p9  ;;  %p3552_p10 = por %p3551_p7, %p3550_p3 }
  0x50   : > { %p3553_p1 = pnand %p3552_p10, %p3546_p13 }
  0x52   : > { %3556 = shalt.err (!%p3553_p1)
}
  0x53   : > { %s4729_s2 = smov 16   ;;  %s4730_s20 = smov 256  }
  0x54   : > { %2925 = dma.hbm_to_vmem [thread:$0]  (!%p3826_p12), %s3823_s7, 1024, %s3830_s11, %s3837_s18, %s4730_s20, %s4730_s20, %s4729_s2  }
  0x55   : > { %s253_s13 = scalar_lea.vmem [#allocation7], %s3818_s16  ;;  %s249_s12 = sand.u32 1, %s3661_s24  }
  0x56   : > { %s261_s30 = sshll.u32 %s253_s13, 4  ;;  %s3872_s10 = scalar_lea.sflag [#allocation8], %s249_s12  ;;  %s3870_s30 = int_to_ptr.vmem [resolvable:$true] %s261_s30 }
  0x57   : > { %s3557_s8 = scalar_lea.hbm %s3835_s17, 1024  ;;  %s3562_s23 = scalar_lea.hbm %s4699_s1, 2048 }
  0x58   : > { %p3558_p5 = scmp.ne.s32.totalorder %s3835_s17, %s3557_s8  ;;  %p3563_p6 = scmp.lt.u32.totalorder %s3835_s17, %s4699_s1 }
  0x59   : > { %p3564_p8 = scmp.lt.u32.totalorder %s3562_s23, %s3557_s8  ;;  %p3566_p13 = scmp.lt.u32.totalorder %s3557_s8, %s3835_s17 }
  0x5a   : > { %p3560_p2 = pnand %p3558_p5, %p3529_p0 }
  0x5b   : > { %p3565_p9 = por %p3564_p8, %p3563_p6 }
  0x5c   : > { %p3561_p4 = pneg %p3560_p2 }
  0x5d   : > { %p3567_p3 = por %p3566_p13, %p3565_p9 }
  0x5f   : > { %p3568_p7 = pnand %p3567_p3, %p3561_p4 }
  0x61   : > { %3571 = shalt.err (!%p3568_p7)
}
  0x62   : > { %s3572_s16 = scalar_lea.vmem %s3870_s30, 1024  ;;  %s3667_s7 = smov [#allocation7]  }
  0x63   : > { %p3573_p10 = scmp.ne.s32.totalorder %s3870_s30, %s3572_s16  ;;  %s3577_s11 = sshll.u32 %s3667_s7, 4  ;;  %s3578_s11 = int_to_ptr.vmem [resolvable:$false] %s3577_s11 }
  0x64   : > { %s3579_s0 = scalar_lea.vmem %s3578_s11, 2048  ;;  %p3580_p2 = scmp.lt.s32.totalorder %s3870_s30, %s3578_s11 }
  0x65   : > { %p3575_p1 = pnand %p3573_p10, %p3529_p0  ;;  %p3581_p6 = scmp.lt.s32.totalorder %s3579_s0, %s3572_s16 }
  0x67   : > { %p3576_p5 = pneg %p3575_p1  ;;  %p3582_p8 = por %p3581_p6, %p3580_p2 }
  0x69   : > { %p3583_p9 = pnand %p3582_p8, %p3576_p5 }
  0x6b   : > { %3586 = shalt.err (!%p3583_p9)
}
  0x6c   : > { %2928 = dma.hbm_to_vmem [thread:$0]  (!%p3826_p12), %s3835_s17, 1024, %s3870_s30, %s3872_s10, %s4730_s20, %s4730_s20, %s4729_s2  }
  0x6d   : > { %p4731_p0 = scmp.ne.s32.totalorder %s4720_s29, 0 }
  0x6e   : > { %s3904_s9 = sand.u32 (!%p4731_p0), 1, %s3653_s22   ;;  %p4732_p4 = scmp.ne.s32.totalorder (!%p4731_p0), %s4718_s27, 0 }
  0x6f   : > { %273 = sbr.rel (%p4731_p0) target bundleno = 843 (0x34b), region = 44  ;;  %s2567_s18 = sshll.u32 (!%p4731_p0), %s3904_s9, 6 }
  0x70   : > { %s276_s13 = scalar_lea.sflag (!%p4731_p0), [#allocation5], %s3904_s9  ;;  %s3908_s12 = scalar_lea.vmem (!%p4731_p0), [#allocation4], %s2567_s18 }
  0x76   : > { %3632 = dma.done.wait (%p4732_p4), %s276_s13, 1024  }
  0x77   : > { %3634 = vsyncadd (%p4732_p4), %s276_s13, 4294966272  ;;  %s284_s19 = sand.u32 1, %s3738_s25   ;;  %s288_s17 = scalar_lea.vmem [#allocation7], %s2567_s18 }
  0x78   : > { %s285_s29 = scalar_lea.sflag [#allocation8], %s284_s19 }
  0x79   : > { %3636 = dma.done.wait (%p4732_p4), %s285_s29, 1024  }
  0x7a   : > { %3638 = vsyncadd (%p4732_p4), %s285_s29, 4294966272  ;;  %p4733_p12 = scmp.eq.s32.totalorder %s3738_s25, 0 }
  0x7c   : > { %3640 = dma.done.wait (%p4733_p12), [#allocation8], 1024   ;;  %p4734_p13 = pmov %p4733_p12 }
  0x7d   : > { %s3923_s2 = scalar_lea.vmem [#allocation10], %s2567_s18  ;;  %p4735_p3 = scmp.ne.s32.totalorder %s3738_s25, 0 }
  0x7e   : > { %3642 = vsyncadd (%p4734_p13), [#allocation8], 4294966272  ;;  %vm333_vm0 = vcmask (!%p4735_p3), 138240   ;;  %vm336_vm1 = vcmask (!%p4735_p3), 277640   ;;  %v3668_v0 = vmov (!%p4735_p3), 0.0  }
  0x7f   : > { %332 = sbr.rel (%p4735_p3) target bundleno = 134 (0x86), region = 60  ;;  %334 = vst.msk [vmem:[#allocation2] sm:$0xff] (!%p4735_p3), %vm333_vm0, %v3668_v0  ;;  %335 = vst.msk [vmem:[#allocation2 + $0x18] sm:$0xff] (!%p4735_p3), %vm333_vm0, %v3668_v0 }
  0x80   : > { %337 = vst.msk [vmem:[#allocation2 + $0x10] sm:$0xff] (!%p4735_p3), %vm336_vm1, %v3668_v0  ;;  %338 = vst.msk [vmem:[#allocation2 + $0x28] sm:$0xff] (!%p4735_p3), %vm336_vm1, %v3668_v0 }
  0x86 PF: > { %v372_v1 = vld [vmem:[%s288_s17 + $0x10] sm:$0xff]  ;;  %v370_v2 = vld [vmem:[%s288_s17] sm:$0xff]  ;;  %s3669_s27 = smov 17   ;;  %v373_v3 = vld [vmem:[%s288_s17 + $0x18] sm:$0xff]  ;;  %v339_v17 = vlaneseq  ;;  %vm395_vm2 = vcmask 1047688   ;;  %vm386_vm3 = vcmask 138240  }
  0x87   : > { %382 = vrot.lane.b32.xlu1 %v372_v1, %s3669_s27  ;;  %378 = vrot.lane.b32.xlu0 %v370_v2, %s3669_s27  ;;  %v371_v4 = vld [vmem:[%s288_s17 + $0x8] sm:$0xff]  ;;  %v2572_v6 = vld [vmem:[%s288_s17 + $0x20] sm:$0xff]  ;;  %s3670_s20 = smov 126   ;;  %s3671_s30 = smov 127   ;;  %vm1169_vm8 = vcmask 130048   ;;  %vm442_vm9 = vcmask 1039360  }
  0x88   : > { %v2573_v5 = vld [vmem:[%s288_s17 + $0x28] sm:$0xff]  ;;  %v2575_v7 = vld [vmem:[%s288_s17 + $0x38] sm:$0xff]  ;;  %v2574_v8 = vld [vmem:[%s288_s17 + $0x30] sm:$0xff]  ;;  %v3935_v18 = vand.u32 127, %v339_v17  ;;  %s3672_s10 = smov 112   ;;  %s3673_s8 = smov 111  }
  0x89   : > { %v1361_v9 = vld [vmem:[%s3908_s12 + $0x8] sm:$0xff]  ;;  %v1360_v10 = vld [vmem:[%s3908_s12] sm:$0xff]  ;;  %v1363_v11 = vld [vmem:[%s3908_s12 + $0x18] sm:$0xff]  ;;  %s3674_s26 = smov 110   ;;  %s3675_s15 = smov 96   ;;  %vm483_vm10 = vcmask 1031168  }
  0x8a   : > { %v1362_v12 = vld [vmem:[%s3908_s12 + $0x10] sm:$0xff]  ;;  %v2585_v13 = vld [vmem:[%s3908_s12 + $0x28] sm:$0xff]  ;;  %v2584_v14 = vld [vmem:[%s3908_s12 + $0x20] sm:$0xff]  ;;  %v3938_v19 = vadd.s32 128, %v3935_v18  ;;  %v346_v23 = vand.u32 15, %v3935_v18  ;;  %s3676_s23 = smov 95  }
  0x8b   : > { %384 = vrot.lane.b32.xlu1 %v373_v3, %s3669_s27  ;;  %380 = vrot.lane.b32.xlu0 %v371_v4, %s3669_s27  ;;  %v2587_v15 = vld [vmem:[%s3908_s12 + $0x38] sm:$0xff]  ;;  %v2586_v16 = vld [vmem:[%s3908_s12 + $0x30] sm:$0xff]  ;;  %s3677_s16 = smov 94   ;;  %vm524_vm12 = vcmask 916480   ;;  %vm565_vm0 = vcmask 908288   ;;  %vm602_vm1 = vcmask 900096  }
  0x8c   : > { %v353_v20 = vand.u32 15, %v3938_v19  ;;  %vm366_vm6 = vcmp.ne.s32.totalorder %v346_v23, 0  ;;  %vm4213_vm13 = vcmp.ne.s32.totalorder %v346_v23, 15  ;;  %v2061_v23 = vld [vmem:[%s4702_s4] sm:$0xff]  ;;  %s3679_s13 = smov [#allocation10]  }
  0x8d   : > { %vm3961_vm7 = vmpackc.low %vm366_vm6, %vm366_vm6  ;;  %s3591_s19 = sshll.u32 %s3679_s13, 4  ;;  %s3592_s19 = int_to_ptr.vmem [resolvable:$false] %s3591_s19 }
  0x8e   : > { %vm367_vm4 = vcmp.ne.s32.totalorder %v353_v20, 0  ;;  %vm4199_vm11 = vcmp.ne.s32.totalorder %v353_v20, 15  ;;  %vm4235_vm15 = vmpackc.low %vm4213_vm13, %vm4213_vm13  ;;  %s3593_s29 = scalar_lea.vmem %s3592_s19, 2048 }
  0x8f   : > { %749 = vrot.lane.b32.xlu1 %v2573_v5, %s3669_s27  ;;  %747 = vrot.lane.b32.xlu0 %v2572_v6, %s3669_s27  ;;  %vm3952_vm5 = vmpackc.low %vm367_vm4, %vm367_vm4  ;;  %vm721_vm4 = vcmask 769024  }
  0x90   : > { %vm4227_vm14 = vmpackc.low %vm4199_vm11, %vm4199_vm11 }
  0x93   : > { %753 = vrot.lane.b32.xlu1 %v2575_v7, %s3669_s27  ;;  %751 = vrot.lane.b32.xlu0 %v2574_v8, %s3669_s27 }
  0x97   : > { %1370 = vrot.lane.b32.xlu1 %v1361_v9, %s3669_s27  ;;  %1368 = vrot.lane.b32.xlu0 %v1360_v10, %s3669_s27 }
  0x9b   : > { %1374 = vrot.lane.b32.xlu1 %v1363_v11, %s3669_s27  ;;  %1372 = vrot.lane.b32.xlu0 %v1362_v12, %s3669_s27 }
  0x9f   : > { %1721 = vrot.lane.b32.xlu1 %v2585_v13, %s3669_s27  ;;  %1719 = vrot.lane.b32.xlu0 %v2584_v14, %s3669_s27 }
  0xa3   : > { %1725 = vrot.lane.b32.xlu1 %v2587_v15, %s3669_s27  ;;  %1723 = vrot.lane.b32.xlu0 %v2586_v16, %s3669_s27  ;;  %v1090_v15 = vld [vmem:[#allocation9 + $0x8] sm:$0xff] }
  0xa4   : > { %2576 = vmatprep.mubr.msk.f32.mxu0 %vm1169_vm8, %v1090_v15  ;;  %2580 = vmatprep.mubr.msk.f32.mxu1 %vm1169_vm8, %v1090_v15 }
  0xf9   : > { %v383_v21 = vpop.permute.xlu1 %382  ;;  %v379_v22 = vpop.permute.xlu0 %378 }
  0xfa   : > { %399 = vst.msk [vmem:[#allocation2 + $0x18] sm:$0xff] %vm395_vm2, %v383_v21  ;;  %396 = vst.msk [vmem:[#allocation2] sm:$0xff] %vm395_vm2, %v379_v22 }
  0xfd   : > { %v385_v24 = vpop.permute.xlu1 %384  ;;  %v381_v25 = vpop.permute.xlu0 %380 }
  0xfe   : > { %v388_v26 = vsel %vm386_vm3, %v383_v21, %v385_v24  ;;  %401 = vst.msk [vmem:[#allocation2 + $0x28] sm:$0xff] %vm386_vm3, %v385_v24  ;;  %v3949_v27 = vsel %vm386_vm3, %v379_v22, %v381_v25  ;;  %398 = vst.msk [vmem:[#allocation2 + $0x10] sm:$0xff] %vm386_vm3, %v381_v25 }
  0xff   : > { %v2716_v29 = vpack.c.bf16 %v388_v26, %v3949_v27 }
 0x101   : > { %v458_v30 = vld [vmem:[#allocation2 + $0x18] sm:$0xff]  ;;  %2718 = vmatprep.subr.msk.bf16.mxu0 %vm3952_vm5, %v2716_v29  ;;  %v402_v31 = vld [vmem:[#allocation2] sm:$0xff]  ;;  %v750_v33 = vpop.permute.xlu1 %749  ;;  %v748_v34 = vpop.permute.xlu0 %747 }
 0x102   : > { %v2719_v35 = vpack.c.bf16 %v458_v30, %v402_v31  ;;  %763 = vst.msk [vmem:[#allocation2] sm:$0xff] %vm395_vm2, %v748_v34  ;;  %v3969_v36 = vsel %vm386_vm3, %v748_v34, %v750_v33  ;;  %v2995_v47 = vpack.i.bf16 %v458_v30, %v402_v31  ;;  %v3035_v48 = vpack.i.bf16 %v3949_v27, %v402_v31 }
 0x104   : > { %2721 = vmatpush1.bf16.msk.msra.mxu0 %vm3961_vm7, %v2719_v35 }
 0x105   : > { %v3971_v37 = vld [vmem:[#allocation2 + $0x10] sm:$0xff]  ;;  %v505_v38 = vld [vmem:[#allocation2 + $0x28] sm:$0xff]  ;;  %v754_v39 = vpop.permute.xlu1 %753  ;;  %v752_v40 = vpop.permute.xlu0 %751 }
 0x106   : > { %v2990_v41 = vpack.i.bf16 %v458_v30, %v3971_v37  ;;  %v3975_v42 = vsel %vm386_vm3, %v752_v40, %v754_v39  ;;  %766 = vst.msk [vmem:[#allocation2 + $0x18] sm:$0xff] %vm395_vm2, %v752_v40  ;;  %v3050_v55 = vpack.i.bf16 %v505_v38, %v388_v26  ;;  %v3045_v14 = vpack.i.bf16 %v3971_v37, %v3949_v27 }
 0x107   : > { %768 = vst.msk [vmem:[#allocation2 + $0x28] sm:$0xff] %vm386_vm3, %v754_v39  ;;  %765 = vst.msk [vmem:[#allocation2 + $0x10] sm:$0xff] %vm386_vm3, %v750_v33  ;;  %v2764_v43 = vpack.c.bf16 %v3975_v42, %v3969_v36 }
 0x108   : > { %2991 = vrot.lane.b32.xlu0 %v2990_v41, %s3670_s20  ;;  %2986 = vrot.lane.b32.xlu1 %v2990_v41, %s3671_s30 }
 0x109   : > { %2766 = vmatprep.subr.msk.bf16.mxu1 %vm3952_vm5, %v2764_v43  ;;  %v769_v44 = vld [vmem:[#allocation2] sm:$0xff]  ;;  %v1371_v45 = vpop.permute.xlu1 %1370  ;;  %v1369_v46 = vpop.permute.xlu0 %1368 }
 0x10a   : > { %1384 = vst.msk [vmem:[#allocation2] sm:$0xff] %vm395_vm2, %v1369_v46  ;;  %v3995_v52 = vsel %vm386_vm3, %v1369_v46, %v1371_v45 }
 0x10c   : > { %2996 = vrot.lane.b32.xlu0 %v2995_v47, %s3672_s10  ;;  %3036 = vrot.lane.b32.xlu1 %v3035_v48, %s3670_s20 }
 0x10d   : > { %v771_v49 = vld [vmem:[#allocation2 + $0x18] sm:$0xff]  ;;  %v1375_v53 = vpop.permute.xlu1 %1374  ;;  %v1373_v54 = vpop.permute.xlu0 %1372 }
 0x10e   : > { %v3990_v50 = vld [vmem:[#allocation2 + $0x10] sm:$0xff]  ;;  %v3992_v51 = vld [vmem:[#allocation2 + $0x28] sm:$0xff]  ;;  %v2767_v56 = vpack.c.bf16 %v771_v49, %v769_v44  ;;  %1387 = vst.msk [vmem:[#allocation2 + $0x18] sm:$0xff] %vm395_vm2, %v1373_v54  ;;  %v4001_v57 = vsel %vm386_vm3, %v1373_v54, %v1375_v53  ;;  %v3105_v13 = vpack.i.bf16 %v771_v49, %v769_v44 }
 0x10f   : > { %1389 = vst.msk [vmem:[#allocation2 + $0x28] sm:$0xff] %vm386_vm3, %v1375_v53  ;;  %1386 = vst.msk [vmem:[#allocation2 + $0x10] sm:$0xff] %vm386_vm3, %v1371_v45  ;;  %v2812_v58 = vpack.c.bf16 %v4001_v57, %v3995_v52  ;;  %v3145_v16 = vpack.i.bf16 %v3990_v50, %v3969_v36  ;;  %v3150_v17 = vpack.i.bf16 %v3992_v51, %v3975_v42 }
 0x110   : > { %3001 = vrot.lane.b32.xlu0 %v2995_v47, %s3673_s8  ;;  %3051 = vrot.lane.b32.xlu1 %v3050_v55, %s3672_s10 }
 0x111   : > { %2769 = vmatpush1.bf16.msk.msra.mxu1 %vm3961_vm7, %v2767_v56  ;;  %v4009_v59 = vld [vmem:[#allocation2] sm:$0xff]  ;;  %v1722_v60 = vpop.permute.xlu1 %1721  ;;  %v1720_v61 = vpop.permute.xlu0 %1719 }
 0x112   : > { %v4012_v62 = vsel %vm386_vm3, %v1720_v61, %v1722_v60  ;;  %1735 = vst.msk [vmem:[#allocation2] sm:$0xff] %vm395_vm2, %v1720_v61 }
 0x114   : > { %3006 = vrot.lane.b32.xlu0 %v2995_v47, %s3674_s26  ;;  %3061 = vrot.lane.b32.xlu1 %v3050_v55, %s3673_s8 }
 0x115   : > { %v4017_v63 = vld [vmem:[#allocation2 + $0x18] sm:$0xff]  ;;  %v1726_v0 = vpop.permute.xlu1 %1725  ;;  %v1724_v1 = vpop.permute.xlu0 %1723 }
 0x116   : > { %v1407_v2 = vld [vmem:[#allocation2 + $0x28] sm:$0xff]  ;;  %v1404_v3 = vld [vmem:[#allocation2 + $0x10] sm:$0xff]  ;;  %v4020_v4 = vsel %vm386_vm3, %v1724_v1, %v1726_v0  ;;  %v4024_v5 = vpack.i.bf16 %v4017_v63, %v4009_v59  ;;  %1738 = vst.msk [vmem:[#allocation2 + $0x18] sm:$0xff] %vm395_vm2, %v1724_v1  ;;  %v2815_v8 = vpack.c.bf16 %v4017_v63, %v4009_v59  ;;  %vm643_vm2 = vcmask 785408  }
 0x117   : > { %v4027_v6 = vpack.i.bf16 %v1407_v2, %v4001_v57  ;;  %1740 = vst.msk [vmem:[#allocation2 + $0x28] sm:$0xff] %vm386_vm3, %v1726_v0  ;;  %v4032_v7 = vpack.i.bf16 %v1404_v3, %v3995_v52  ;;  %1737 = vst.msk [vmem:[#allocation2 + $0x10] sm:$0xff] %vm386_vm3, %v1722_v60  ;;  %v2860_v9 = vpack.c.bf16 %v4020_v4, %v4012_v62  ;;  %vm684_vm3 = vcmask 777216  }
 0x118   : > { %3011 = vrot.lane.b32.xlu0 %v2995_v47, %s3675_s15  ;;  %3071 = vrot.lane.b32.xlu1 %v3050_v55, %s3674_s26 }
 0x119   : > { %v4041_v10 = vld [vmem:[#allocation2] sm:$0xff] }
 0x11c   : > { %3016 = vrot.lane.b32.xlu0 %v2995_v47, %s3676_s23  ;;  %3081 = vrot.lane.b32.xlu1 %v3050_v55, %s3675_s15 }
 0x11d   : > { %v4045_v11 = vld [vmem:[#allocation2 + $0x18] sm:$0xff] }
 0x11e   : > { %v2863_v12 = vpack.c.bf16 %v4045_v11, %v4041_v10  ;;  %v4103_v21 = vpack.i.bf16 %v4045_v11, %v4041_v10  ;;  %v1755_v22 = vld [vmem:[#allocation2 + $0x10] sm:$0xff]  ;;  %v1758_v24 = vld [vmem:[#allocation2 + $0x28] sm:$0xff] }
 0x11f   : > { %v4114_v25 = vpack.i.bf16 %v1755_v22, %v4012_v62  ;;  %v4117_v26 = vpack.i.bf16 %v1758_v24, %v4020_v4 }
 0x120   : > { %3021 = vrot.lane.b32.xlu0 %v2995_v47, %s3677_s16  ;;  %3091 = vrot.lane.b32.xlu1 %v3050_v55, %s3676_s23 }
 0x124   : > { %3101 = vrot.lane.b32.xlu1 %v3050_v55, %s3677_s16  ;;  %3026 = vrot.lane.b32.xlu0 %v3035_v48, %s3671_s30 }
 0x128   : > { %3031 = vrot.lane.b32.xlu0 %v3050_v55, %s3671_s30  ;;  %3106 = vrot.lane.b32.xlu1 %v3105_v13, %s3671_s30 }
 0x12c   : > { %3041 = vrot.lane.b32.xlu0 %v3050_v55, %s3670_s20  ;;  %3111 = vrot.lane.b32.xlu1 %v3105_v13, %s3670_s20 }
 0x130   : > { %3046 = vrot.lane.b32.xlu0 %v3045_v14, %s3672_s10  ;;  %3116 = vrot.lane.b32.xlu1 %v3105_v13, %s3672_s10 }
 0x134   : > { %3056 = vrot.lane.b32.xlu0 %v3045_v14, %s3673_s8  ;;  %3121 = vrot.lane.b32.xlu1 %v3105_v13, %s3673_s8 }
 0x138   : > { %3066 = vrot.lane.b32.xlu0 %v3045_v14, %s3674_s26  ;;  %3126 = vrot.lane.b32.xlu1 %v3105_v13, %s3674_s26 }
 0x13c   : > { %3076 = vrot.lane.b32.xlu0 %v3045_v14, %s3675_s15  ;;  %3131 = vrot.lane.b32.xlu1 %v3105_v13, %s3675_s15 }
 0x140   : > { %3086 = vrot.lane.b32.xlu0 %v3045_v14, %s3676_s23  ;;  %3136 = vrot.lane.b32.xlu1 %v3105_v13, %s3676_s23 }
 0x144   : > { %3096 = vrot.lane.b32.xlu0 %v3045_v14, %s3677_s16  ;;  %3141 = vrot.lane.b32.xlu1 %v3105_v13, %s3677_s16 }
 0x148   : > { %3146 = vrot.lane.b32.xlu1 %v3145_v16, %s3671_s30  ;;  %3151 = vrot.lane.b32.xlu0 %v3150_v17, %s3671_s30 }
 0x14c   : > { %3156 = vrot.lane.b32.xlu1 %v3145_v16, %s3670_s20  ;;  %3161 = vrot.lane.b32.xlu0 %v3150_v17, %s3670_s20 }
 0x150   : > { %3171 = vrot.lane.b32.xlu1 %v3150_v17, %s3672_s10  ;;  %3166 = vrot.lane.b32.xlu0 %v3145_v16, %s3672_s10 }
 0x154   : > { %3181 = vrot.lane.b32.xlu1 %v3150_v17, %s3673_s8  ;;  %3176 = vrot.lane.b32.xlu0 %v3145_v16, %s3673_s8 }
 0x158   : > { %3191 = vrot.lane.b32.xlu1 %v3150_v17, %s3674_s26  ;;  %3186 = vrot.lane.b32.xlu0 %v3145_v16, %s3674_s26 }
 0x15c   : > { %3201 = vrot.lane.b32.xlu1 %v3150_v17, %s3675_s15  ;;  %3196 = vrot.lane.b32.xlu0 %v3145_v16, %s3675_s15 }
 0x160   : > { %3211 = vrot.lane.b32.xlu1 %v3150_v17, %s3676_s23  ;;  %3206 = vrot.lane.b32.xlu0 %v3145_v16, %s3676_s23 }
 0x164   : > { %3221 = vrot.lane.b32.xlu1 %v3150_v17, %s3677_s16  ;;  %3216 = vrot.lane.b32.xlu0 %v3145_v16, %s3677_s16 }
 0x168   : > { %3226 = vrot.lane.b32.xlu0 %v4024_v5, %s3671_s30  ;;  %3241 = vrot.lane.b32.xlu1 %v4027_v6, %s3671_s30 }
 0x16c   : > { %3231 = vrot.lane.b32.xlu0 %v4024_v5, %s3670_s20  ;;  %3251 = vrot.lane.b32.xlu1 %v4027_v6, %s3670_s20 }
 0x170   : > { %3236 = vrot.lane.b32.xlu0 %v4032_v7, %s3671_s30  ;;  %3256 = vrot.lane.b32.xlu1 %v4103_v21, %s3671_s30 }
 0x174   : > { %3246 = vrot.lane.b32.xlu0 %v4032_v7, %s3670_s20  ;;  %3261 = vrot.lane.b32.xlu1 %v4103_v21, %s3670_s20 }
 0x178   : > { %3266 = vrot.lane.b32.xlu0 %v4114_v25, %s3671_s30  ;;  %3271 = vrot.lane.b32.xlu1 %v4117_v26, %s3671_s30 }
 0x17a   : > { %v2987_v27 = vpop.permute.xlu1 %2986  ;;  %v4123_v29 = vpop.permute.xlu0 %2991 }
 0x17b   : > { %v2989_v49 = vunpack.i.h.bf16 %v2987_v27  ;;  %v2988_v50 = vunpack.i.l.bf16 %v2987_v27  ;;  %v2994_v15 = vunpack.i.h.bf16 %v4123_v29  ;;  %v2993_v16 = vunpack.i.l.bf16 %v4123_v29 }
 0x17c   : > { %3276 = vrot.lane.b32.xlu0 %v4114_v25, %s3670_s20  ;;  %3286 = vrot.lane.b32.xlu1 %v4117_v26, %s3670_s20 }
 0x17e   : > { %v4129_v30 = vpop.permute.xlu1 %3036  ;;  %v4131_v31 = vpop.permute.xlu0 %2996 }
 0x17f   : > { %v3039_v54 = vunpack.i.h.bf16 %v4129_v30  ;;  %v3038_v55 = vunpack.i.l.bf16 %v4129_v30 }
 0x180   : > { %3281 = vrot.lane.b32.xlu0 %v4032_v7, %s3672_s10  ;;  %3291 = vrot.lane.b32.xlu1 %v4027_v6, %s3672_s10 }
 0x181   : > { %v484_v20 = vsel %vm483_vm10, %v3038_v55, %v3039_v54  ;;  %v485_v29 = vsel %vm483_vm10, %v3039_v54, %v2993_v16 }
 0x182   : > { %v4137_v33 = vpop.permute.xlu1 %3051  ;;  %v4139_v34 = vpop.permute.xlu0 %3001 }
 0x183   : > { %v3054_v24 = vunpack.i.h.bf16 %v4137_v33  ;;  %v3053_v27 = vunpack.i.l.bf16 %v4137_v33  ;;  %v3004_v14 = vunpack.i.h.bf16 %v4139_v34 }
 0x184   : > { %3296 = vrot.lane.b32.xlu0 %v4114_v25, %s3672_s10  ;;  %3301 = vrot.lane.b32.xlu1 %v4117_v26, %s3672_s10 }
 0x185   : > { %v528_v55 = vsel %vm524_vm12, %v3053_v27, %v3054_v24 }
 0x186   : > { %v4145_v35 = vpop.permute.xlu1 %3061  ;;  %v4147_v36 = vpop.permute.xlu0 %3006 }
 0x188   : > { %3306 = vrot.lane.b32.xlu0 %v4024_v5, %s3672_s10  ;;  %3311 = vrot.lane.b32.xlu1 %v4103_v21, %s3672_s10 }
 0x18a   : > { %v4153_v37 = vpop.permute.xlu1 %3071  ;;  %v4155_v38 = vpop.permute.xlu0 %3011 }
 0x18c   : > { %3316 = vrot.lane.b32.xlu0 %v4032_v7, %s3673_s8  ;;  %3321 = vrot.lane.b32.xlu1 %v4027_v6, %s3673_s8 }
 0x18e   : > { %v4161_v39 = vpop.permute.xlu1 %3081  ;;  %v4163_v40 = vpop.permute.xlu0 %3016 }
 0x190   : > { %3326 = vrot.lane.b32.xlu0 %v4114_v25, %s3673_s8  ;;  %3331 = vrot.lane.b32.xlu1 %v4117_v26, %s3673_s8 }
 0x192   : > { %v4169_v41 = vpop.permute.xlu1 %3091  ;;  %v4171_v42 = vpop.permute.xlu0 %3021 }
 0x194   : > { %3336 = vrot.lane.b32.xlu0 %v4024_v5, %s3673_s8  ;;  %3341 = vrot.lane.b32.xlu1 %v4103_v21, %s3673_s8 }
 0x196   : > { %v4177_v43 = vpop.permute.xlu1 %3101  ;;  %v3027_v44 = vpop.permute.xlu0 %3026 }
 0x197   : > { %v3029_v45 = vunpack.i.h.bf16 %v3027_v44  ;;  %v3028_v46 = vunpack.i.l.bf16 %v3027_v44  ;;  %v2999_v44 = vunpack.i.h.bf16 %v4131_v31 }
 0x198   : > { %3346 = vrot.lane.b32.xlu0 %v4032_v7, %s3674_s26  ;;  %3351 = vrot.lane.b32.xlu1 %v4027_v6, %s3674_s26 }
 0x199   : > { %v444_v56 = vsel %vm442_vm9, %v3029_v45, %v2988_v50  ;;  %v443_v61 = vsel %vm442_vm9, %v3028_v46, %v3029_v45  ;;  %v527_v54 = vsel %vm524_vm12, %v2999_v44, %v3053_v27  ;;  %v3008_v44 = vunpack.i.l.bf16 %v4147_v36 }
 0x19a   : > { %v4183_v47 = vpop.permute.xlu1 %3106  ;;  %v3032_v48 = vpop.permute.xlu0 %3031 }
 0x19b   : > { %v3034_v51 = vunpack.i.h.bf16 %v3032_v48  ;;  %v3033_v53 = vunpack.i.l.bf16 %v3032_v48 }
 0x19c   : > { %3356 = vrot.lane.b32.xlu0 %v4114_v25, %s3674_s26  ;;  %3361 = vrot.lane.b32.xlu1 %v4117_v26, %s3674_s26 }
 0x19d   : > { %v446_v60 = vsel %vm442_vm9, %v3033_v53, %v3034_v51  ;;  %v445_v0 = vsel %vm442_vm9, %v2989_v49, %v3033_v53  ;;  %v2998_v49 = vunpack.i.l.bf16 %v4131_v31  ;;  %v3064_v31 = vunpack.i.h.bf16 %v4145_v35 }
 0x19e   : > { %v4195_v1 = vpop.permute.xlu1 %3111  ;;  %v3042_v2 = vpop.permute.xlu0 %3041  ;;  %v2722_v3 = vpack.c.bf16 %v446_v60, %v444_v56  ;;  %v2724_v13 = vpack.c.bf16 %v445_v0, %v443_v61  ;;  %v3063_v56 = vunpack.i.l.bf16 %v4145_v35  ;;  %v3003_v35 = vunpack.i.l.bf16 %v4139_v34 }
 0x19f   : > { %v3044_v17 = vunpack.i.h.bf16 %v3042_v2  ;;  %v3043_v22 = vunpack.i.l.bf16 %v3042_v2 }
 0x1a0   : > { %3366 = vrot.lane.b32.xlu0 %v4024_v5, %s3674_s26  ;;  %3371 = vrot.lane.b32.xlu1 %v4103_v21, %s3674_s26  ;;  %v569_v34 = vsel %vm565_vm0, %v3063_v56, %v3064_v31  ;;  %v568_v19 = vsel %vm565_vm0, %v3004_v14, %v3063_v56  ;;  %v3093_v14 = vunpack.i.l.bf16 %v4169_v41 }
 0x1a1   : > { %v486_v30 = vsel %vm483_vm10, %v2994_v15, %v3043_v22  ;;  %v487_v33 = vsel %vm483_vm10, %v3043_v22, %v3044_v17  ;;  %2723 = vmatprep.subr.bf16.mxu0 %v2722_v3  ;;  %v3074_v17 = vunpack.i.h.bf16 %v4153_v37  ;;  %v3073_v22 = vunpack.i.l.bf16 %v4153_v37 }
 0x1a2   : > { %v2726_v45 = vpack.c.bf16 %v487_v33, %v485_v29  ;;  %v2729_v46 = vpack.c.bf16 %v486_v30, %v484_v20  ;;  %2725 = vmatpush1.bf16.msra.mxu0 %v2724_v13  ;;  %v4222_v48 = vpop.permute.xlu1 %3116  ;;  %v3047_v18 = vpop.permute.xlu0 %3046  ;;  %v3009_v20 = vunpack.i.h.bf16 %v4147_v36 }
 0x1a3   : > { %v3049_v50 = vunpack.i.h.bf16 %v3047_v18  ;;  %v3048_v51 = vunpack.i.l.bf16 %v3047_v18  ;;  %v3119_v57 = vunpack.i.h.bf16 %v4222_v48 }
 0x1a4   : > { %3376 = vrot.lane.b32.xlu0 %v4032_v7, %s3675_s15  ;;  %3381 = vrot.lane.b32.xlu1 %v4027_v6, %s3675_s15  ;;  %v605_v18 = vsel %vm602_vm1, %v3009_v20, %v3073_v22 }
 0x1a5   : > { %v525_v60 = vsel %vm524_vm12, %v2998_v49, %v3048_v51  ;;  %v526_v61 = vsel %vm524_vm12, %v3048_v51, %v3049_v50  ;;  %2728 = vmatprep.subr.msk.bf16.mxu0 %vm4227_vm14, %v2726_v45  ;;  %v606_v49 = vsel %vm602_vm1, %v3073_v22, %v3074_v17  ;;  %v3084_v50 = vunpack.i.h.bf16 %v4161_v39 }
 0x1a6   : > { %v2732_v0 = vpack.c.bf16 %v528_v55, %v526_v61  ;;  %v2735_v2 = vpack.c.bf16 %v527_v54, %v525_v60  ;;  %2731 = vmatpush1.bf16.msk.msra.mxu0 %vm4235_vm15, %v2729_v46  ;;  %v4253_v3 = vpop.permute.xlu1 %3121  ;;  %v3057_v13 = vpop.permute.xlu0 %3056  ;;  %v3083_v51 = vunpack.i.l.bf16 %v4161_v39  ;;  %v3014_v61 = vunpack.i.h.bf16 %v4155_v38 }
 0x1a7   : > { %v3059_v15 = vunpack.i.h.bf16 %v3057_v13  ;;  %v3058_v16 = vunpack.i.l.bf16 %v3057_v13  ;;  %v3094_v39 = vunpack.i.h.bf16 %v4169_v41  ;;  %v3019_v41 = vunpack.i.h.bf16 %v4163_v40 }
 0x1a8   : > { %3386 = vrot.lane.b32.xlu0 %v4114_v25, %s3675_s15  ;;  %3391 = vrot.lane.b32.xlu1 %v4117_v26, %s3675_s15 }
 0x1a9   : > { %2734 = vmatprep.subr.msk.bf16.mxu0 %vm3952_vm5, %v2732_v0  ;;  %v567_v24 = vsel %vm565_vm0, %v3058_v16, %v3059_v15  ;;  %v566_v27 = vsel %vm565_vm0, %v3003_v35, %v3058_v16  ;;  %v3013_v0 = vunpack.i.l.bf16 %v4155_v38  ;;  %v646_v35 = vsel %vm643_vm2, %v3014_v61, %v3083_v51 }
 0x1aa   : > { %2737 = vmatpush1.bf16.msk.msra.mxu0 %vm3961_vm7, %v2735_v2  ;;  %v4272_v37 = vpop.permute.xlu1 %3126  ;;  %v3067_v29 = vpop.permute.xlu0 %3066  ;;  %v2738_v30 = vpack.c.bf16 %v569_v34, %v567_v24  ;;  %v2740_v33 = vpack.c.bf16 %v568_v19, %v566_v27  ;;  %v647_v15 = vsel %vm643_vm2, %v3083_v51, %v3084_v50  ;;  %v3018_v27 = vunpack.i.l.bf16 %v4163_v40 }
 0x1ab   : > { %v3069_v45 = vunpack.i.h.bf16 %v3067_v29  ;;  %v3068_v46 = vunpack.i.l.bf16 %v3067_v29  ;;  %v688_v29 = vsel %vm684_vm3, %v3093_v14, %v3094_v39  ;;  %v3024_v51 = vunpack.i.h.bf16 %v4171_v42 }
 0x1ac   : > { %3396 = vrot.lane.b32.xlu0 %v4024_v5, %s3675_s15  ;;  %3401 = vrot.lane.b32.xlu1 %v4103_v21, %s3675_s15 }
 0x1ad   : > { %v603_v54 = vsel %vm602_vm1, %v3008_v44, %v3068_v46  ;;  %v604_v36 = vsel %vm602_vm1, %v3068_v46, %v3069_v45  ;;  %2739 = vmatprep.subr.bf16.mxu0 %v2738_v30  ;;  %v687_v30 = vsel %vm684_vm3, %v3019_v41, %v3093_v14  ;;  %v3103_v44 = vunpack.i.l.bf16 %v4177_v43 }
 0x1ae   : > { %v2742_v55 = vpack.c.bf16 %v606_v49, %v604_v36  ;;  %v2745_v31 = vpack.c.bf16 %v605_v18, %v603_v54  ;;  %2741 = vmatpush1.bf16.msra.mxu0 %v2740_v33  ;;  %v4285_v56 = vpop.permute.xlu1 %3131  ;;  %v3077_v60 = vpop.permute.xlu0 %3076  ;;  %v3104_v33 = vunpack.i.h.bf16 %v4177_v43  ;;  %v3023_v43 = vunpack.i.l.bf16 %v4171_v42 }
 0x1af   : > { %v3079_v2 = vunpack.i.h.bf16 %v3077_v60  ;;  %v3078_v13 = vunpack.i.l.bf16 %v3077_v60  ;;  %v3108_v42 = vunpack.i.l.bf16 %v4183_v47 }
 0x1b0   : > { %3406 = vrot.lane.b32.xlu0 %v4032_v7, %s3676_s23  ;;  %3411 = vrot.lane.b32.xlu1 %v4027_v6, %s3676_s23 }
 0x1b1   : > { %v644_v16 = vsel %vm643_vm2, %v3013_v0, %v3078_v13  ;;  %v645_v38 = vsel %vm643_vm2, %v3078_v13, %v3079_v2  ;;  %2744 = vmatprep.subr.msk.bf16.mxu0 %vm4227_vm14, %v2742_v55  ;;  %v724_v55 = vsel %vm721_vm4, %v3024_v51, %v3103_v44  ;;  %v3109_v0 = vunpack.i.h.bf16 %v4183_v47 }
 0x1b2   : > { %v2748_v17 = vpack.c.bf16 %v647_v15, %v645_v38  ;;  %v2751_v22 = vpack.c.bf16 %v646_v35, %v644_v16  ;;  %2747 = vmatpush1.bf16.msk.msra.mxu0 %vm4235_vm15, %v2745_v31  ;;  %v4304_v24 = vpop.permute.xlu1 %3136  ;;  %v3087_v34 = vpop.permute.xlu0 %3086  ;;  %v725_v31 = vsel %vm721_vm4, %v3103_v44, %v3104_v33 }
 0x1b3   : > { %v3089_v19 = vunpack.i.h.bf16 %v3087_v34  ;;  %v3088_v20 = vunpack.i.l.bf16 %v3087_v34  ;;  %v3114_v34 = vunpack.i.h.bf16 %v4195_v1 }
 0x1b4   : > { %3416 = vrot.lane.b32.xlu0 %v4114_v25, %s3676_s23  ;;  %3421 = vrot.lane.b32.xlu1 %v4117_v26, %s3676_s23 }
 0x1b5   : > { %2750 = vmatprep.subr.msk.bf16.mxu0 %vm3952_vm5, %v2748_v17  ;;  %v686_v40 = vsel %vm684_vm3, %v3088_v20, %v3089_v19  ;;  %v685_v45 = vsel %vm684_vm3, %v3018_v27, %v3088_v20  ;;  %v3113_v27 = vunpack.i.l.bf16 %v4195_v1  ;;  %v4360_v1 = vld [vmem:[#allocation9 + $0x18] sm:$0xff] }
 0x1b6   : > { %2753 = vmatpush1.bf16.msk.msra.mxu0 %vm3961_vm7, %v2751_v22  ;;  %v4321_v46 = vpop.permute.xlu1 %3141  ;;  %v3097_v18 = vpop.permute.xlu0 %3096  ;;  %v2754_v49 = vpack.c.bf16 %v688_v29, %v686_v40  ;;  %v2756_v50 = vpack.c.bf16 %v687_v30, %v685_v45  ;;  %v4354_v40 = vld [vmem:[#allocation9] sm:$0xff] }
 0x1b7   : > { %v3099_v54 = vunpack.i.h.bf16 %v3097_v18  ;;  %v3098_v36 = vunpack.i.l.bf16 %v3097_v18 }
 0x1b8   : > { %3426 = vrot.lane.b32.xlu0 %v4024_v5, %s3676_s23  ;;  %3431 = vrot.lane.b32.xlu1 %v4103_v21, %s3676_s23 }
 0x1b9   : > { %v722_v60 = vsel %vm721_vm4, %v3023_v43, %v3098_v36  ;;  %v723_v61 = vsel %vm721_vm4, %v3098_v36, %v3099_v54  ;;  %2755 = vmatprep.subr.bf16.mxu0 %v2754_v49 }
 0x1ba   : > { %v2758_v2 = vpack.c.bf16 %v725_v31, %v723_v61  ;;  %v2761_v13 = vpack.c.bf16 %v724_v55, %v722_v60  ;;  %2757 = vmatpush1.bf16.msra.mxu0 %v2756_v50  ;;  %v3147_v39 = vpop.permute.xlu1 %3146  ;;  %v3152_v14 = vpop.permute.xlu0 %3151  ;;  %v4382_v31 = vld [vmem:[#allocation9 + $0x28] sm:$0xff]  ;;  %v3124_v61 = vunpack.i.h.bf16 %v4253_v3 }
 0x1bb   : > { %v3149_v35 = vunpack.i.h.bf16 %v3147_v39  ;;  %v3148_v15 = vunpack.i.l.bf16 %v3147_v39  ;;  %v3154_v16 = vunpack.i.h.bf16 %v3152_v14  ;;  %v3153_v38 = vunpack.i.l.bf16 %v3152_v14 }
 0x1bc   : > { %3436 = vrot.lane.b32.xlu0 %v4032_v7, %s3677_s16  ;;  %3441 = vrot.lane.b32.xlu1 %v4027_v6, %s3677_s16 }
 0x1bd   : > { %2760 = vmatprep.subr.msk.bf16.mxu0 %vm4227_vm14, %v2758_v2  ;;  %v806_v47 = vsel %vm442_vm9, %v3148_v15, %v3149_v35  ;;  %v808_v41 = vsel %vm442_vm9, %v3153_v38, %v3154_v16  ;;  %v805_v17 = vsel %vm442_vm9, %v3108_v42, %v3148_v15  ;;  %v807_v22 = vsel %vm442_vm9, %v3109_v0, %v3153_v38  ;;  %v4400_v16 = vld [vmem:[#allocation9 + $0x20] sm:$0xff] }
 0x1be   : > { %2763 = vmatpush1.bf16.msk.msra.mxu0 %vm4235_vm15, %v2761_v13  ;;  %v3157_v7 = vpop.permute.xlu1 %3156  ;;  %v3162_v6 = vpop.permute.xlu0 %3161  ;;  %v2770_v19 = vpack.c.bf16 %v808_v41, %v806_v47  ;;  %v2772_v20 = vpack.c.bf16 %v807_v22, %v805_v17  ;;  %v3678_v38 = vmov 0   ;;  %v2310_v47 = vld [vmem:[%s4701_s3 + $0x8] sm:$0xff] }
 0x1bf   : > { %v3159_v29 = vunpack.i.h.bf16 %v3157_v7  ;;  %v3158_v30 = vunpack.i.l.bf16 %v3157_v7  ;;  %v3164_v33 = vunpack.i.h.bf16 %v3162_v6  ;;  %v3163_v44 = vunpack.i.l.bf16 %v3162_v6  ;;  %2814 = vmatprep.subr.msk.bf16.mxu0 %vm3952_vm5, %v2812_v58  ;;  %3465 = vset.pattern.permute.xlu0 %v3678_v38 }
 0x1c0   : > { %3446 = vrot.lane.b32.xlu0 %v4114_v25, %s3677_s16  ;;  %3451 = vrot.lane.b32.xlu1 %v4117_v26, %s3677_s16  ;;  %v3118_v58 = vunpack.i.l.bf16 %v4222_v48  ;;  %v4376_v48 = vld [vmem:[#allocation9 + $0x10] sm:$0xff]  ;;  %v3129_v7 = vunpack.i.h.bf16 %v4272_v37  ;;  %v3128_v6 = vunpack.i.l.bf16 %v4272_v37  ;;  %v4428_v37 = vld [vmem:[%s4702_s4 + $0x8] sm:$0xff] }
 0x1c1   : > { %v841_v45 = vsel %vm483_vm10, %v3113_v27, %v3158_v30  ;;  %v842_v18 = vsel %vm483_vm10, %v3158_v30, %v3159_v29  ;;  %v843_v49 = vsel %vm483_vm10, %v3114_v34, %v3163_v44  ;;  %v844_v52 = vsel %vm483_vm10, %v3163_v44, %v3164_v33  ;;  %2771 = vmatprep.subr.bf16.mxu1 %v2770_v19  ;;  %v2138_v27 = vld [vmem:[%s4703_s5 + $0x8] sm:$0xff] }
 0x1c2   : > { %v2774_v50 = vpack.c.bf16 %v844_v52, %v842_v18  ;;  %v2777_v25 = vpack.c.bf16 %v843_v49, %v841_v45  ;;  %1247 = vmatmul.mubr.f32.vlgmr.msra.gmra.mrb[0].mxu0 %v4354_v40  ;;  %2773 = vmatpush1.bf16.msra.mxu1 %v2772_v20  ;;  %v3172_v26 = vpop.permute.xlu1 %3171  ;;  %v3167_v51 = vpop.permute.xlu0 %3166  ;;  %v4423_v49 = vld [vmem:[#allocation9 + $0x30] sm:$0xff] }
 0x1c3   : > { %2817 = vmatpush1.bf16.msk.msra.mxu0 %vm3961_vm7, %v2815_v8  ;;  %v3174_v43 = vunpack.i.h.bf16 %v3172_v26  ;;  %v3173_v54 = vunpack.i.l.bf16 %v3172_v26  ;;  %v3169_v36 = vunpack.i.h.bf16 %v3167_v51  ;;  %v3168_v55 = vunpack.i.l.bf16 %v3167_v51  ;;  %2577 = vmatprep.mubr.msk.f32.mxu0 %vm1169_vm8, %v4360_v1  ;;  %v2137_v52 = vld [vmem:[%s4703_s5] sm:$0xff] }
 0x1c4   : > { %3456 = vrot.lane.b32.xlu0 %v4024_v5, %s3677_s16  ;;  %3461 = vrot.lane.b32.xlu1 %v4103_v21, %s3677_s16  ;;  %v2309_v5 = vld [vmem:[%s4701_s3] sm:$0xff]  ;;  %v3123_v21 = vunpack.i.l.bf16 %v4253_v3  ;;  %v4404_v3 = vld [vmem:[#allocation9 + $0x38] sm:$0xff]  ;;  %v3134_v26 = vunpack.i.h.bf16 %v4285_v56  ;;  %v3133_v51 = vunpack.i.l.bf16 %v4285_v56  ;;  %s2449_s16 = sshll.u32 %s3923_s2, 4  ;;  %s4651_s16 = int_to_ptr.vmem [resolvable:$true] %s2449_s16 }
 0x1c5   : > { %v883_v59 = vsel %vm524_vm12, %v3119_v57, %v3173_v54  ;;  %v884_v63 = vsel %vm524_vm12, %v3173_v54, %v3174_v43  ;;  %v881_v8 = vsel %vm524_vm12, %v3118_v58, %v3168_v55  ;;  %v882_v60 = vsel %vm524_vm12, %v3168_v55, %v3169_v36  ;;  %2776 = vmatprep.subr.msk.bf16.mxu1 %vm4227_vm14, %v2774_v50  ;;  %s3587_s18 = scalar_lea.vmem %s4651_s16, 1024  ;;  %p3594_p5 = scmp.lt.s32.totalorder %s4651_s16, %s3592_s19 }
 0x1c6   : > { %v2780_v0 = vpack.c.bf16 %v884_v63, %v882_v60  ;;  %v2783_v42 = vpack.c.bf16 %v883_v59, %v881_v8  ;;  %2779 = vmatpush1.bf16.msk.msra.mxu1 %vm4235_vm15, %v2777_v25  ;;  %v3182_v2 = vpop.permute.xlu1 %3181  ;;  %v3177_v13 = vpop.permute.xlu0 %3176  ;;  %1253 = vmatmul.mubr.f32.gmra.mrb[2].mxu0 %v4376_v48  ;;  %p3588_p7 = scmp.ne.s32.totalorder %s4651_s16, %s3587_s18  ;;  %p3595_p2 = scmp.lt.s32.totalorder %s3593_s29, %s3587_s18 }
 0x1c7   : > { %v3184_v39 = vunpack.i.h.bf16 %v3182_v2  ;;  %v3183_v14 = vunpack.i.l.bf16 %v3182_v2  ;;  %v3179_v35 = vunpack.i.h.bf16 %v3177_v13  ;;  %v3178_v15 = vunpack.i.l.bf16 %v3177_v13  ;;  %2578 = vmatprep.mubr.msk.f32.mxu0 %vm1169_vm8, %v4382_v31  ;;  %3466 = vset.pattern.permute.xlu1 %v3678_v38 }
 0x1c8   : > { %2782 = vmatprep.subr.msk.bf16.mxu1 %vm3952_vm5, %v2780_v0  ;;  %2313 = vperm.xlu0 %3465, %v2309_v5   ;;  %v3139_v0 = vunpack.i.h.bf16 %v4304_v24  ;;  %p3589_p10 = pnand %p3588_p7, %p3812_p11  ;;  %p3596_p6 = por %p3595_p2, %p3594_p5 }
 0x1c9   : > { %v922_v41 = vsel %vm565_vm0, %v3178_v15, %v3179_v35  ;;  %v924_v17 = vsel %vm565_vm0, %v3183_v14, %v3184_v39  ;;  %v921_v22 = vsel %vm565_vm0, %v3123_v21, %v3178_v15  ;;  %v923_v34 = vsel %vm565_vm0, %v3124_v61, %v3183_v14  ;;  %2318 = vperm.xlu1 %3466, %v2310_v47  }
 0x1ca   : > { %2785 = vmatpush1.bf16.msk.msra.mxu1 %vm3961_vm7, %v2783_v42  ;;  %v3192_v19 = vpop.permute.xlu1 %3191  ;;  %v3187_v20 = vpop.permute.xlu0 %3186  ;;  %v2786_v29 = vpack.c.bf16 %v924_v17, %v922_v41  ;;  %v2788_v30 = vpack.c.bf16 %v923_v34, %v921_v22  ;;  %1259 = vmatmul.mubr.f32.gmra.mrb[4].mxu0 %v4400_v16  ;;  %v3138_v42 = vunpack.i.l.bf16 %v4304_v24  ;;  %v3144_v34 = vunpack.i.h.bf16 %v4321_v46  ;;  %p3590_p1 = pneg %p3589_p10 }
 0x1cb   : > { %v3194_v33 = vunpack.i.h.bf16 %v3192_v19  ;;  %v3193_v44 = vunpack.i.l.bf16 %v3192_v19  ;;  %v3189_v45 = vunpack.i.h.bf16 %v3187_v20  ;;  %v3188_v18 = vunpack.i.l.bf16 %v3187_v20  ;;  %2579 = vmatprep.mubr.msk.f32.mxu0 %vm1169_vm8, %v4404_v3 }
 0x1cc   : > { %2787 = vmatprep.subr.bf16.mxu1 %v2786_v29  ;;  %2146 = vperm.xlu0 %3465, %v2138_v27   ;;  %v3143_v27 = vunpack.i.l.bf16 %v4321_v46  ;;  %p3597_p8 = pnand %p3596_p6, %p3590_p1 }
 0x1cd   : > { %v959_v57 = vsel %vm602_vm1, %v3129_v7, %v3193_v44  ;;  %v960_v58 = vsel %vm602_vm1, %v3193_v44, %v3194_v33  ;;  %v957_v50 = vsel %vm602_vm1, %v3128_v6, %v3188_v18  ;;  %v958_v25 = vsel %vm602_vm1, %v3188_v18, %v3189_v45  ;;  %2141 = vperm.xlu1 %3466, %v2137_v52  }
 0x1ce   : > { %v2790_v43 = vpack.c.bf16 %v960_v58, %v958_v25  ;;  %v2793_v54 = vpack.c.bf16 %v959_v57, %v957_v50  ;;  %2789 = vmatpush1.bf16.msra.mxu1 %v2788_v30  ;;  %v3202_v36 = vpop.permute.xlu1 %3201  ;;  %v3197_v55 = vpop.permute.xlu0 %3196  ;;  %1265 = vmatmul.mubr.f32.gmra.mrb[6].mxu0 %v4423_v49 }
 0x1cf   : > { %v3204_v59 = vunpack.i.h.bf16 %v3202_v36  ;;  %v3203_v63 = vunpack.i.l.bf16 %v3202_v36  ;;  %v3199_v8 = vunpack.i.h.bf16 %v3197_v55  ;;  %v3198_v60 = vunpack.i.l.bf16 %v3197_v55  ;;  %2588 = vmatprep.mubr.msk.f32.mxu0 %vm1169_vm8, %v4428_v37 }
 0x1d0   : > { %2792 = vmatprep.subr.msk.bf16.mxu1 %vm4227_vm14, %v2790_v43 }
 0x1d1   : > { %v999_v56 = vsel %vm643_vm2, %v3134_v26, %v3203_v63  ;;  %v1000_v5 = vsel %vm643_vm2, %v3203_v63, %v3204_v59  ;;  %v997_v61 = vsel %vm643_vm2, %v3133_v51, %v3198_v60  ;;  %v998_v21 = vsel %vm643_vm2, %v3198_v60, %v3199_v8 }
 0x1d2   : > { %v2796_v2 = vpack.c.bf16 %v1000_v5, %v998_v21  ;;  %v2799_v13 = vpack.c.bf16 %v999_v56, %v997_v61  ;;  %2795 = vmatpush1.bf16.msk.msra.mxu1 %vm4235_vm15, %v2793_v54  ;;  %v3212_v39 = vpop.permute.xlu1 %3211  ;;  %v3207_v14 = vpop.permute.xlu0 %3206 }
 0x1d3   : > { %v3214_v35 = vunpack.i.h.bf16 %v3212_v39  ;;  %v3213_v15 = vunpack.i.l.bf16 %v3212_v39  ;;  %v3209_v38 = vunpack.i.h.bf16 %v3207_v14  ;;  %v3208_v47 = vunpack.i.l.bf16 %v3207_v14 }
 0x1d4   : > { %2798 = vmatprep.subr.msk.bf16.mxu1 %vm3952_vm5, %v2796_v2 }
 0x1d5   : > { %v1038_v41 = vsel %vm684_vm3, %v3208_v47, %v3209_v38  ;;  %v1040_v17 = vsel %vm684_vm3, %v3213_v15, %v3214_v35  ;;  %v1037_v24 = vsel %vm684_vm3, %v3138_v42, %v3208_v47  ;;  %v1039_v22 = vsel %vm684_vm3, %v3139_v0, %v3213_v15 }
 0x1d6   : > { %2801 = vmatpush1.bf16.msk.msra.mxu1 %vm3961_vm7, %v2799_v13  ;;  %v3222_v7 = vpop.permute.xlu1 %3221  ;;  %v3217_v6 = vpop.permute.xlu0 %3216  ;;  %v2802_v19 = vpack.c.bf16 %v1040_v17, %v1038_v41  ;;  %v2804_v20 = vpack.c.bf16 %v1039_v22, %v1037_v24 }
 0x1d7   : > { %v3224_v29 = vunpack.i.h.bf16 %v3222_v7  ;;  %v3223_v30 = vunpack.i.l.bf16 %v3222_v7  ;;  %v3219_v33 = vunpack.i.h.bf16 %v3217_v6  ;;  %v3218_v44 = vunpack.i.l.bf16 %v3217_v6 }
 0x1d8   : > { %2803 = vmatprep.subr.bf16.mxu1 %v2802_v19 }
 0x1d9   : > { %v1075_v45 = vsel %vm721_vm4, %v3144_v34, %v3223_v30  ;;  %v1076_v18 = vsel %vm721_vm4, %v3223_v30, %v3224_v29  ;;  %v1073_v52 = vsel %vm721_vm4, %v3143_v27, %v3218_v44  ;;  %v1074_v46 = vsel %vm721_vm4, %v3218_v44, %v3219_v33 }
 0x1da   : > { %v2806_v57 = vpack.c.bf16 %v1076_v18, %v1074_v46  ;;  %v2809_v58 = vpack.c.bf16 %v1075_v45, %v1073_v52  ;;  %2805 = vmatpush1.bf16.msra.mxu1 %v2804_v20  ;;  %v3242_v50 = vpop.permute.xlu1 %3241  ;;  %v3227_v25 = vpop.permute.xlu0 %3226 }
 0x1db   : > { %v3243_v43 = vunpack.i.l.bf16 %v3242_v50  ;;  %v3229_v54 = vunpack.i.h.bf16 %v3227_v25  ;;  %v3244_v36 = vunpack.i.h.bf16 %v3242_v50  ;;  %v3228_v62 = vunpack.i.l.bf16 %v3227_v25 }
 0x1dc   : > { %2808 = vmatprep.subr.msk.bf16.mxu1 %vm4227_vm14, %v2806_v57 }
 0x1dd   : > { %v1429_v11 = vsel %vm442_vm9, %v3243_v43, %v3244_v36 }
 0x1de   : > { %2811 = vmatpush1.bf16.msk.msra.mxu1 %vm4235_vm15, %v2809_v58  ;;  %v3252_v26 = vpop.permute.xlu1 %3251  ;;  %v3232_v51 = vpop.permute.xlu0 %3231 }
 0x1df   : > { %2862 = vmatprep.subr.msk.bf16.mxu1 %vm3952_vm5, %v2860_v9  ;;  %v1428_v9 = vsel %vm442_vm9, %v3229_v54, %v3243_v43  ;;  %v3254_v8 = vunpack.i.h.bf16 %v3252_v26  ;;  %v3253_v60 = vunpack.i.l.bf16 %v3252_v26  ;;  %v3234_v56 = vunpack.i.h.bf16 %v3232_v51 }
 0x1e0   : > { %v3233_v21 = vunpack.i.l.bf16 %v3232_v51 }
 0x1e1   : > { %1336 = vmatmul.mubr.f32.vlgmr.msra.gmra.mrb[0].mxu1 %v4354_v40  ;;  %v1465_v2 = vsel %vm483_vm10, %v3253_v60, %v3254_v8  ;;  %v1464_v13 = vsel %vm483_vm10, %v3234_v56, %v3253_v60 }
 0x1e2   : > { %2865 = vmatpush1.bf16.msk.msra.mxu1 %vm3961_vm7, %v2863_v12  ;;  %v3257_v55 = vpop.permute.xlu1 %3256  ;;  %v3237_v59 = vpop.permute.xlu0 %3236  ;;  %2581 = vmatprep.mubr.msk.f32.mxu1 %vm1169_vm8, %v4360_v1 }
 0x1e3   : > { %v3239_v4 = vunpack.i.h.bf16 %v3237_v59  ;;  %v3238_v63 = vunpack.i.l.bf16 %v3237_v59  ;;  %v3258_v35 = vunpack.i.l.bf16 %v3257_v55 }
 0x1e5   : > { %v1426_v40 = vsel %vm442_vm9, %v3228_v62, %v3238_v63  ;;  %v1427_v10 = vsel %vm442_vm9, %v3238_v63, %v3239_v4  ;;  %1342 = vmatmul.mubr.f32.gmra.mrb[2].mxu1 %v4376_v48  ;;  %v3259_v48 = vunpack.i.h.bf16 %v3257_v55 }
 0x1e6   : > { %v2820_v12 = vpack.c.bf16 %v1428_v9, %v1426_v40  ;;  %v3262_v5 = vpop.permute.xlu1 %3261  ;;  %v3247_v61 = vpop.permute.xlu0 %3246  ;;  %v2818_v1 = vpack.c.bf16 %v1429_v11, %v1427_v10  ;;  %2582 = vmatprep.mubr.msk.f32.mxu1 %vm1169_vm8, %v4382_v31 }
 0x1e7   : > { %v3249_v0 = vunpack.i.h.bf16 %v3247_v61  ;;  %v3248_v42 = vunpack.i.l.bf16 %v3247_v61  ;;  %v3264_v6 = vunpack.i.h.bf16 %v3262_v5 }
 0x1e8   : > { %2819 = vmatprep.subr.bf16.mxu0 %v2818_v1 }
 0x1e9   : > { %v1462_v39 = vsel %vm483_vm10, %v3233_v21, %v3248_v42  ;;  %v1463_v14 = vsel %vm483_vm10, %v3248_v42, %v3249_v0  ;;  %2821 = vmatpush1.bf16.msra.mxu0 %v2820_v12  ;;  %1348 = vmatmul.mubr.f32.gmra.mrb[4].mxu1 %v4400_v16 }
 0x1ea   : > { %v2822_v15 = vpack.c.bf16 %v1465_v2, %v1463_v14  ;;  %v2825_v38 = vpack.c.bf16 %v1464_v13, %v1462_v39  ;;  %v3272_v31 = vpop.permute.xlu1 %3271  ;;  %v3267_v47 = vpop.permute.xlu0 %3266  ;;  %2583 = vmatprep.mubr.msk.f32.mxu1 %vm1169_vm8, %v4404_v3  ;;  %v3263_v3 = vunpack.i.l.bf16 %v3262_v5 }
 0x1eb   : > { %v3274_v41 = vunpack.i.h.bf16 %v3272_v31  ;;  %v3273_v17 = vunpack.i.l.bf16 %v3272_v31  ;;  %v3269_v24 = vunpack.i.h.bf16 %v3267_v47  ;;  %v3268_v22 = vunpack.i.l.bf16 %v3267_v47 }
 0x1ec   : > { %2824 = vmatprep.subr.msk.bf16.mxu0 %vm4227_vm14, %v2822_v15 }
 0x1ed   : > { %v1779_v34 = vsel %vm442_vm9, %v3259_v48, %v3273_v17  ;;  %v1777_v16 = vsel %vm442_vm9, %v3258_v35, %v3268_v22  ;;  %2827 = vmatpush1.bf16.msk.msra.mxu0 %vm4235_vm15, %v2825_v38  ;;  %v1778_v27 = vsel %vm442_vm9, %v3268_v22, %v3269_v24  ;;  %v1780_v7 = vsel %vm442_vm9, %v3273_v17, %v3274_v41 }
 0x1ee   : > { %v2868_v19 = vpack.c.bf16 %v1779_v34, %v1777_v16  ;;  %v3287_v20 = vpop.permute.xlu1 %3286  ;;  %v3277_v29 = vpop.permute.xlu0 %3276  ;;  %v2866_v30 = vpack.c.bf16 %v1780_v7, %v1778_v27  ;;  %1354 = vmatmul.mubr.f32.gmra.mrb[6].mxu1 %v4423_v49 }
 0x1ef   : > { %v3289_v33 = vunpack.i.h.bf16 %v3287_v20  ;;  %v3288_v44 = vunpack.i.l.bf16 %v3287_v20  ;;  %v3279_v45 = vunpack.i.h.bf16 %v3277_v29  ;;  %v3278_v18 = vunpack.i.l.bf16 %v3277_v29  ;;  %2590 = vmatprep.mubr.msk.f32.mxu1 %vm1169_vm8, %v4428_v37 }
 0x1f0   : > { %2867 = vmatprep.subr.bf16.mxu1 %v2866_v30 }
 0x1f1   : > { %v1815_v52 = vsel %vm483_vm10, %v3264_v6, %v3288_v44  ;;  %v1816_v46 = vsel %vm483_vm10, %v3288_v44, %v3289_v33  ;;  %v1813_v57 = vsel %vm483_vm10, %v3263_v3, %v3278_v18  ;;  %v1814_v58 = vsel %vm483_vm10, %v3278_v18, %v3279_v45  ;;  %2869 = vmatpush1.bf16.msra.mxu1 %v2868_v19 }
 0x1f2   : > { %v2870_v50 = vpack.c.bf16 %v1816_v46, %v1814_v58  ;;  %v2873_v25 = vpack.c.bf16 %v1815_v52, %v1813_v57  ;;  %v3292_v49 = vpop.permute.xlu1 %3291  ;;  %v3282_v26 = vpop.permute.xlu0 %3281 }
 0x1f3   : > { %v3294_v51 = vunpack.i.h.bf16 %v3292_v49  ;;  %v3293_v43 = vunpack.i.l.bf16 %v3292_v49  ;;  %v3284_v54 = vunpack.i.h.bf16 %v3282_v26  ;;  %v3283_v36 = vunpack.i.l.bf16 %v3282_v26 }
 0x1f4   : > { %2872 = vmatprep.subr.msk.bf16.mxu1 %vm4227_vm14, %v2870_v50 }
 0x1f5   : > { %v1505_v37 = vsel %vm524_vm12, %v3293_v43, %v3294_v51  ;;  %v1503_v55 = vsel %vm524_vm12, %v3283_v36, %v3284_v54  ;;  %2875 = vmatpush1.bf16.msk.msra.mxu1 %vm4235_vm15, %v2873_v25 }
 0x1f6   : > { %v2828_v59 = vpack.c.bf16 %v1505_v37, %v1503_v55  ;;  %v3302_v62 = vpop.permute.xlu1 %3301  ;;  %v3297_v4 = vpop.permute.xlu0 %3296 }
 0x1f7   : > { %v3304_v63 = vunpack.i.h.bf16 %v3302_v62  ;;  %v3303_v9 = vunpack.i.l.bf16 %v3302_v62  ;;  %v3299_v8 = vunpack.i.h.bf16 %v3297_v4  ;;  %v3298_v60 = vunpack.i.l.bf16 %v3297_v4 }
 0x1f8   : > { %2830 = vmatprep.subr.msk.bf16.mxu0 %vm3952_vm5, %v2828_v59 }
 0x1f9   : > { %v1856_v56 = vsel %vm524_vm12, %v3303_v9, %v3304_v63  ;;  %v1854_v40 = vsel %vm524_vm12, %v3298_v60, %v3299_v8 }
 0x1fa   : > { %v2876_v10 = vpack.c.bf16 %v1856_v56, %v1854_v40  ;;  %v3312_v11 = vpop.permute.xlu1 %3311  ;;  %v3307_v12 = vpop.permute.xlu0 %3306 }
 0x1fb   : > { %v3314_v5 = vunpack.i.h.bf16 %v3312_v11  ;;  %v3313_v61 = vunpack.i.l.bf16 %v3312_v11  ;;  %v3309_v1 = vunpack.i.h.bf16 %v3307_v12  ;;  %v3308_v21 = vunpack.i.l.bf16 %v3307_v12 }
 0x1fc   : > { %2878 = vmatprep.subr.msk.bf16.mxu1 %vm3952_vm5, %v2876_v10 }
 0x1fd   : > { %v1853_v0 = vsel %vm524_vm12, %v3313_v61, %v3298_v60  ;;  %v1855_v42 = vsel %vm524_vm12, %v3314_v5, %v3303_v9  ;;  %v1504_v2 = vsel %vm524_vm12, %v3309_v1, %v3293_v43  ;;  %v1502_v13 = vsel %vm524_vm12, %v3308_v21, %v3283_v36 }
 0x1fe   : > { %v2879_v39 = vpack.c.bf16 %v1855_v42, %v1853_v0  ;;  %v2831_v14 = vpack.c.bf16 %v1504_v2, %v1502_v13  ;;  %v3322_v48 = vpop.permute.xlu1 %3321  ;;  %v3317_v35 = vpop.permute.xlu0 %3316 }
 0x1ff   : > { %v3324_v15 = vunpack.i.h.bf16 %v3322_v48  ;;  %v3323_v38 = vunpack.i.l.bf16 %v3322_v48  ;;  %v3319_v31 = vunpack.i.h.bf16 %v3317_v35  ;;  %v3318_v47 = vunpack.i.l.bf16 %v3317_v35 }
 0x200   : > { %2833 = vmatpush1.bf16.msk.msra.mxu0 %vm3961_vm7, %v2831_v14  ;;  %2881 = vmatpush1.bf16.msk.msra.mxu1 %vm3961_vm7, %v2879_v39 }
 0x201   : > { %v1543_v41 = vsel %vm565_vm0, %v3318_v47, %v3319_v31  ;;  %v1545_v17 = vsel %vm565_vm0, %v3323_v38, %v3324_v15 }
 0x202   : > { %v3332_v24 = vpop.permute.xlu1 %3331  ;;  %v3327_v22 = vpop.permute.xlu0 %3326  ;;  %v2834_v34 = vpack.c.bf16 %v1545_v17, %v1543_v41 }
 0x203   : > { %v3334_v16 = vunpack.i.h.bf16 %v3332_v24  ;;  %v3333_v27 = vunpack.i.l.bf16 %v3332_v24  ;;  %v3329_v7 = vunpack.i.h.bf16 %v3327_v22  ;;  %v3328_v6 = vunpack.i.l.bf16 %v3327_v22 }
 0x204   : > { %2835 = vmatprep.subr.bf16.mxu0 %v2834_v34 }
 0x205   : > { %v1894_v3 = vsel %vm565_vm0, %v3328_v6, %v3329_v7  ;;  %v1896_v19 = vsel %vm565_vm0, %v3333_v27, %v3334_v16 }
 0x206   : > { %v3342_v20 = vpop.permute.xlu1 %3341  ;;  %v3337_v29 = vpop.permute.xlu0 %3336  ;;  %v2882_v30 = vpack.c.bf16 %v1896_v19, %v1894_v3 }
 0x207   : > { %v3344_v33 = vunpack.i.h.bf16 %v3342_v20  ;;  %v3343_v44 = vunpack.i.l.bf16 %v3342_v20  ;;  %v3339_v45 = vunpack.i.h.bf16 %v3337_v29  ;;  %v3338_v18 = vunpack.i.l.bf16 %v3337_v29 }
 0x208   : > { %2883 = vmatprep.subr.bf16.mxu1 %v2882_v30 }
 0x209   : > { %v1893_v52 = vsel %vm565_vm0, %v3343_v44, %v3328_v6  ;;  %v1895_v46 = vsel %vm565_vm0, %v3344_v33, %v3333_v27  ;;  %v1544_v57 = vsel %vm565_vm0, %v3339_v45, %v3323_v38  ;;  %v1542_v58 = vsel %vm565_vm0, %v3338_v18, %v3318_v47 }
 0x20a   : > { %v2884_v50 = vpack.c.bf16 %v1895_v46, %v1893_v52  ;;  %v2836_v25 = vpack.c.bf16 %v1544_v57, %v1542_v58  ;;  %v3352_v49 = vpop.permute.xlu1 %3351  ;;  %v3347_v26 = vpop.permute.xlu0 %3346 }
 0x20b   : > { %v3354_v51 = vunpack.i.h.bf16 %v3352_v49  ;;  %v3353_v43 = vunpack.i.l.bf16 %v3352_v49  ;;  %v3349_v54 = vunpack.i.h.bf16 %v3347_v26  ;;  %v3348_v36 = vunpack.i.l.bf16 %v3347_v26 }
 0x20c   : > { %2837 = vmatpush1.bf16.msra.mxu0 %v2836_v25  ;;  %2885 = vmatpush1.bf16.msra.mxu1 %v2884_v50 }
 0x20d   : > { %v1581_v37 = vsel %vm602_vm1, %v3353_v43, %v3354_v51  ;;  %v1579_v55 = vsel %vm602_vm1, %v3348_v36, %v3349_v54 }
 0x20e   : > { %v2838_v59 = vpack.c.bf16 %v1581_v37, %v1579_v55  ;;  %v3362_v62 = vpop.permute.xlu1 %3361  ;;  %v3357_v4 = vpop.permute.xlu0 %3356 }
 0x20f   : > { %v3364_v63 = vunpack.i.h.bf16 %v3362_v62  ;;  %v3363_v9 = vunpack.i.l.bf16 %v3362_v62  ;;  %v3359_v8 = vunpack.i.h.bf16 %v3357_v4  ;;  %v3358_v60 = vunpack.i.l.bf16 %v3357_v4 }
 0x210   : > { %2840 = vmatprep.subr.msk.bf16.mxu0 %vm4227_vm14, %v2838_v59 }
 0x211   : > { %v1932_v56 = vsel %vm602_vm1, %v3363_v9, %v3364_v63  ;;  %v1930_v40 = vsel %vm602_vm1, %v3358_v60, %v3359_v8 }
 0x212   : > { %v2886_v10 = vpack.c.bf16 %v1932_v56, %v1930_v40  ;;  %v3372_v11 = vpop.permute.xlu1 %3371  ;;  %v3367_v12 = vpop.permute.xlu0 %3366 }
 0x213   : > { %v3374_v5 = vunpack.i.h.bf16 %v3372_v11  ;;  %v3373_v61 = vunpack.i.l.bf16 %v3372_v11  ;;  %v3369_v1 = vunpack.i.h.bf16 %v3367_v12  ;;  %v3368_v21 = vunpack.i.l.bf16 %v3367_v12 }
 0x214   : > { %2888 = vmatprep.subr.msk.bf16.mxu1 %vm4227_vm14, %v2886_v10 }
 0x215   : > { %v1929_v0 = vsel %vm602_vm1, %v3373_v61, %v3358_v60  ;;  %v1931_v42 = vsel %vm602_vm1, %v3374_v5, %v3363_v9  ;;  %v1580_v2 = vsel %vm602_vm1, %v3369_v1, %v3353_v43  ;;  %v1578_v13 = vsel %vm602_vm1, %v3368_v21, %v3348_v36 }
 0x216   : > { %v2889_v39 = vpack.c.bf16 %v1931_v42, %v1929_v0  ;;  %v2841_v14 = vpack.c.bf16 %v1580_v2, %v1578_v13  ;;  %v3382_v48 = vpop.permute.xlu1 %3381  ;;  %v3377_v35 = vpop.permute.xlu0 %3376 }
 0x217   : > { %v3384_v15 = vunpack.i.h.bf16 %v3382_v48  ;;  %v3383_v38 = vunpack.i.l.bf16 %v3382_v48  ;;  %v3379_v31 = vunpack.i.h.bf16 %v3377_v35  ;;  %v3378_v47 = vunpack.i.l.bf16 %v3377_v35 }
 0x218   : > { %2843 = vmatpush1.bf16.msk.msra.mxu0 %vm4235_vm15, %v2841_v14  ;;  %2891 = vmatpush1.bf16.msk.msra.mxu1 %vm4235_vm15, %v2889_v39 }
 0x219   : > { %v1621_v41 = vsel %vm643_vm2, %v3383_v38, %v3384_v15  ;;  %v1619_v17 = vsel %vm643_vm2, %v3378_v47, %v3379_v31 }
 0x21a   : > { %v2844_v24 = vpack.c.bf16 %v1621_v41, %v1619_v17  ;;  %v3392_v22 = vpop.permute.xlu1 %3391  ;;  %v3387_v34 = vpop.permute.xlu0 %3386 }
 0x21b   : > { %v3394_v16 = vunpack.i.h.bf16 %v3392_v22  ;;  %v3393_v27 = vunpack.i.l.bf16 %v3392_v22  ;;  %v3389_v7 = vunpack.i.h.bf16 %v3387_v34  ;;  %v3388_v6 = vunpack.i.l.bf16 %v3387_v34 }
 0x21c   : > { %2846 = vmatprep.subr.msk.bf16.mxu0 %vm3952_vm5, %v2844_v24 }
 0x21d   : > { %v1972_v3 = vsel %vm643_vm2, %v3393_v27, %v3394_v16  ;;  %v1970_v19 = vsel %vm643_vm2, %v3388_v6, %v3389_v7 }
 0x21e   : > { %v2892_v20 = vpack.c.bf16 %v1972_v3, %v1970_v19  ;;  %v3402_v29 = vpop.permute.xlu1 %3401  ;;  %v3397_v30 = vpop.permute.xlu0 %3396 }
 0x21f   : > { %v3404_v33 = vunpack.i.h.bf16 %v3402_v29  ;;  %v3403_v44 = vunpack.i.l.bf16 %v3402_v29  ;;  %v3399_v45 = vunpack.i.h.bf16 %v3397_v30  ;;  %v3398_v18 = vunpack.i.l.bf16 %v3397_v30 }
 0x220   : > { %2894 = vmatprep.subr.msk.bf16.mxu1 %vm3952_vm5, %v2892_v20 }
 0x221   : > { %v1969_v52 = vsel %vm643_vm2, %v3403_v44, %v3388_v6  ;;  %v1971_v46 = vsel %vm643_vm2, %v3404_v33, %v3393_v27  ;;  %v1620_v57 = vsel %vm643_vm2, %v3399_v45, %v3383_v38  ;;  %v1618_v58 = vsel %vm643_vm2, %v3398_v18, %v3378_v47 }
 0x222   : > { %v2895_v50 = vpack.c.bf16 %v1971_v46, %v1969_v52  ;;  %v2847_v25 = vpack.c.bf16 %v1620_v57, %v1618_v58  ;;  %v3412_v49 = vpop.permute.xlu1 %3411  ;;  %v3407_v26 = vpop.permute.xlu0 %3406 }
 0x223   : > { %v3414_v51 = vunpack.i.h.bf16 %v3412_v49  ;;  %v3413_v43 = vunpack.i.l.bf16 %v3412_v49  ;;  %v3409_v54 = vunpack.i.h.bf16 %v3407_v26  ;;  %v3408_v36 = vunpack.i.l.bf16 %v3407_v26 }
 0x224   : > { %2849 = vmatpush1.bf16.msk.msra.mxu0 %vm3961_vm7, %v2847_v25  ;;  %2897 = vmatpush1.bf16.msk.msra.mxu1 %vm3961_vm7, %v2895_v50  ;;  %v2064_v50 = vld [vmem:[%s4702_s4 + $0x18] sm:$0xff]  ;;  %v2063_v25 = vld [vmem:[%s4702_s4 + $0x10] sm:$0xff] }
 0x225   : > { %v1659_v28 = vsel %vm684_vm3, %v3408_v36, %v3409_v54  ;;  %v1661_v37 = vsel %vm684_vm3, %v3413_v43, %v3414_v51 }
 0x226   : > { %v3422_v55 = vpop.permute.xlu1 %3421  ;;  %v3417_v59 = vpop.permute.xlu0 %3416  ;;  %v2850_v62 = vpack.c.bf16 %v1661_v37, %v1659_v28 }
 0x227   : > { %v3424_v4 = vunpack.i.h.bf16 %v3422_v55  ;;  %v3423_v63 = vunpack.i.l.bf16 %v3422_v55  ;;  %v3419_v9 = vunpack.i.h.bf16 %v3417_v59  ;;  %v3418_v8 = vunpack.i.l.bf16 %v3417_v59 }
 0x228   : > { %2851 = vmatprep.subr.bf16.mxu0 %v2850_v62 }
 0x229   : > { %v2010_v60 = vsel %vm684_vm3, %v3418_v8, %v3419_v9  ;;  %v2012_v56 = vsel %vm684_vm3, %v3423_v63, %v3424_v4 }
 0x22a   : > { %v3432_v40 = vpop.permute.xlu1 %3431  ;;  %v3427_v10 = vpop.permute.xlu0 %3426  ;;  %v2898_v32 = vpack.c.bf16 %v2012_v56, %v2010_v60 }
 0x22b   : > { %v3434_v11 = vunpack.i.h.bf16 %v3432_v40  ;;  %v3433_v12 = vunpack.i.l.bf16 %v3432_v40  ;;  %v3429_v5 = vunpack.i.h.bf16 %v3427_v10  ;;  %v3428_v61 = vunpack.i.l.bf16 %v3427_v10 }
 0x22c   : > { %2899 = vmatprep.subr.bf16.mxu1 %v2898_v32 }
 0x22d   : > { %v2009_v1 = vsel %vm684_vm3, %v3433_v12, %v3418_v8  ;;  %v2011_v21 = vsel %vm684_vm3, %v3434_v11, %v3423_v63  ;;  %v1660_v0 = vsel %vm684_vm3, %v3429_v5, %v3413_v43  ;;  %v1658_v42 = vsel %vm684_vm3, %v3428_v61, %v3408_v36  ;;  %v2329_v12 = vld [vmem:[%s3908_s12] sm:$0xff]  ;;  %v2330_v61 = vld [vmem:[%s3908_s12 + $0x8] sm:$0xff] }
 0x22e   : > { %v2900_v2 = vpack.c.bf16 %v2011_v21, %v2009_v1  ;;  %v2852_v13 = vpack.c.bf16 %v1660_v0, %v1658_v42  ;;  %v3442_v39 = vpop.permute.xlu1 %3441  ;;  %v3437_v14 = vpop.permute.xlu0 %3436  ;;  %v2596_v5 = vld [vmem:[%s3908_s12 + $0x20] sm:$0xff]  ;;  %v2597_v1 = vld [vmem:[%s3908_s12 + $0x28] sm:$0xff] }
 0x22f   : > { %v3444_v48 = vunpack.i.h.bf16 %v3442_v39  ;;  %v3443_v35 = vunpack.i.l.bf16 %v3442_v39  ;;  %v3439_v15 = vunpack.i.h.bf16 %v3437_v14  ;;  %v3438_v38 = vunpack.i.l.bf16 %v3437_v14  ;;  %v2331_v39 = vld [vmem:[%s3908_s12 + $0x10] sm:$0xff]  ;;  %v2599_v14 = vld [vmem:[%s3908_s12 + $0x38] sm:$0xff] }
 0x230   : > { %2853 = vmatpush1.bf16.msra.mxu0 %v2852_v13  ;;  %2901 = vmatpush1.bf16.msra.mxu1 %v2900_v2  ;;  %v2332_v2 = vld [vmem:[%s3908_s12 + $0x18] sm:$0xff] }
 0x231   : > { %v1697_v31 = vsel %vm721_vm4, %v3443_v35, %v3444_v48  ;;  %v1695_v47 = vsel %vm721_vm4, %v3438_v38, %v3439_v15  ;;  %v2598_v15 = vld [vmem:[%s3908_s12 + $0x30] sm:$0xff]  ;;  %s2619_s12 = sshll.u32 %s3738_s25, 10  ;;  %s2435_s25 = scalar_lea.sflag [#allocation6], %s3904_s9 }
 0x232   : > { %v2854_v41 = vpack.c.bf16 %v1697_v31, %v1695_v47  ;;  %v3452_v17 = vpop.permute.xlu1 %3451  ;;  %v3447_v24 = vpop.permute.xlu0 %3446  ;;  %s4649_s0 = scalar_lea.hbm %s4704_s6, %s2619_s12 }
 0x233   : > { %v3454_v22 = vunpack.i.h.bf16 %v3452_v17  ;;  %v3453_v34 = vunpack.i.l.bf16 %v3452_v17  ;;  %v3449_v16 = vunpack.i.h.bf16 %v3447_v24  ;;  %v3448_v27 = vunpack.i.l.bf16 %v3447_v24 }
 0x234   : > { %2856 = vmatprep.subr.msk.bf16.mxu0 %vm4227_vm14, %v2854_v41 }
 0x235   : > { %v2048_v7 = vsel %vm721_vm4, %v3453_v34, %v3454_v22  ;;  %v2046_v6 = vsel %vm721_vm4, %v3448_v27, %v3449_v16 }
 0x236   : > { %v2902_v3 = vpack.c.bf16 %v2048_v7, %v2046_v6  ;;  %v3462_v19 = vpop.permute.xlu1 %3461  ;;  %v3457_v20 = vpop.permute.xlu0 %3456 }
 0x237   : > { %v3464_v29 = vunpack.i.h.bf16 %v3462_v19  ;;  %v3463_v30 = vunpack.i.l.bf16 %v3462_v19  ;;  %v3459_v33 = vunpack.i.h.bf16 %v3457_v20  ;;  %v3458_v44 = vunpack.i.l.bf16 %v3457_v20 }
 0x238   : > { %2904 = vmatprep.subr.msk.bf16.mxu1 %vm4227_vm14, %v2902_v3 }
 0x239   : > { %v2045_v45 = vsel %vm721_vm4, %v3463_v30, %v3448_v27  ;;  %v2047_v18 = vsel %vm721_vm4, %v3464_v29, %v3453_v34  ;;  %v1696_v52 = vsel %vm721_vm4, %v3459_v33, %v3443_v35  ;;  %v1694_v46 = vsel %vm721_vm4, %v3458_v44, %v3438_v38 }
 0x23a   : > { %v2905_v57 = vpack.c.bf16 %v2047_v18, %v2045_v45  ;;  %v2857_v58 = vpack.c.bf16 %v1696_v52, %v1694_v46 }
 0x23c   : > { %2859 = vmatpush1.bf16.msk.msra.mxu0 %vm4235_vm15, %v2857_v58  ;;  %2907 = vmatpush1.bf16.msk.msra.mxu1 %vm4235_vm15, %v2905_v57 }
 0x23f   : > { %2220 = vmatmul.mubr.f32.vlgmr.msra.gmra.mrb[8].mxu0 %v2061_v23  ;;  %2297 = vmatmul.mubr.f32.vlgmr.msra.gmra.mrb[8].mxu1 %v2061_v23 }
 0x240   : > { %2589 = vmatprep.mubr.msk.f32.mxu0 %vm1169_vm8, %v2064_v50  ;;  %2591 = vmatprep.mubr.msk.f32.mxu1 %vm1169_vm8, %v2064_v50 }
 0x243   : > { %2226 = vmatmul.mubr.f32.gmra.mrb[10].mxu0 %v2063_v25  ;;  %2303 = vmatmul.mubr.f32.gmra.mrb[10].mxu1 %v2063_v25 }
 0x247   : > { %v2314_v60 = vpop.permute.xlu0 %2313 }
 0x248   : > { %v2319_v56 = vpop.permute.xlu1 %2318 }
 0x24b   : > { %v2147_v46 = vpop.permute.xlu0 %2146 }
 0x24c   : > { %v2142_v47 = vpop.permute.xlu1 %2141 }
 0x295   : > { %v1248_v53 = vpop.f32.mrb[0].mxu0 }
 0x296   : > { %v1250_v49 = vpop.f32.mrb[1].mxu0  ;;  %v2321_v40 = vadd.f32 %v2314_v60, %v1248_v53 }
 0x297   : > { %v2322_v32 = vadd.f32 %v2314_v60, %v1250_v49 }
 0x298   : > { %v2333_v48 = vadd.f32 %v2329_v12, %v2321_v40 }
 0x299   : > { %v1254_v26 = vpop.f32.mrb[2].mxu0  ;;  %v2334_v38 = vadd.f32 %v2330_v61, %v2322_v32 }
 0x29a   : > { %v1256_v51 = vpop.f32.mrb[3].mxu0  ;;  %v2325_v21 = vadd.f32 %v2319_v56, %v1254_v26  ;;  %v2337_v7 = vmax.f32 %v2333_v48, 0.0 }
 0x29b   : > { %v2326_v0 = vadd.f32 %v2319_v56, %v1256_v51  ;;  %v2338_v29 = vmax.f32 %v2334_v38, 0.0 }
 0x29c   : > { %v2335_v17 = vadd.f32 %v2331_v39, %v2325_v21 }
 0x29d   : > { %v4607_v43 = vpop.f32.mrb[4].mxu0  ;;  %v2336_v41 = vadd.f32 %v2332_v2, %v2326_v0 }
 0x29e   : > { %v4609_v54 = vpop.f32.mrb[5].mxu0  ;;  %v2339_v57 = vmax.f32 %v2335_v17, 0.0 }
 0x29f   : > { %v2340_v45 = vmax.f32 %v2336_v41, 0.0 }
 0x2a1   : > { %v4611_v36 = vpop.f32.mrb[6].mxu0 }
 0x2a2   : > { %v4613_v28 = vpop.f32.mrb[7].mxu0 }
 0x2b4   : > { %v1337_v37 = vpop.f32.mrb[0].mxu1 }
 0x2b5   : > { %v1339_v55 = vpop.f32.mrb[1].mxu1  ;;  %v2323_v10 = vadd.f32 %v2314_v60, %v1337_v37 }
 0x2b6   : > { %v2324_v11 = vadd.f32 %v2314_v60, %v1339_v55 }
 0x2b7   : > { %v2385_v35 = vadd.f32 %v2596_v5, %v2323_v10 }
 0x2b8   : > { %v1343_v59 = vpop.f32.mrb[2].mxu1  ;;  %v2386_v31 = vadd.f32 %v2597_v1, %v2324_v11 }
 0x2b9   : > { %v1345_v62 = vpop.f32.mrb[3].mxu1  ;;  %v2327_v42 = vadd.f32 %v2319_v56, %v1343_v59  ;;  %v2389_v3 = vmax.f32 %v2385_v35, 0.0 }
 0x2ba   : > { %v2328_v13 = vadd.f32 %v2319_v56, %v1345_v62  ;;  %v2390_v30 = vmax.f32 %v2386_v31, 0.0 }
 0x2bb   : > { %v2387_v16 = vadd.f32 %v2598_v15, %v2327_v42 }
 0x2bc   : > { %v4615_v4 = vpop.f32.mrb[4].mxu1  ;;  %v2388_v24 = vadd.f32 %v2599_v14, %v2328_v13 }
 0x2bd   : > { %v4617_v63 = vpop.f32.mrb[5].mxu1  ;;  %v2391_v49 = vmax.f32 %v2387_v16, 0.0 }
 0x2be   : > { %v2392_v58 = vmax.f32 %v2388_v24, 0.0 }
 0x2c1   : > { %v4619_v9 = vpop.f32.mrb[6].mxu1 }
 0x2c2   : > { %v4621_v8 = vpop.f32.mrb[7].mxu1 }
 0x312   : > { %v2221_v22 = vpop.f32.mrb[8].mxu0  ;;  %v2298_v34 = vpop.f32.mrb[8].mxu1 }
 0x313   : > { %v2222_v27 = vadd.f32 %v2221_v22, %v2142_v47  ;;  %v2299_v6 = vadd.f32 %v2298_v34, %v2142_v47  ;;  %v2223_v19 = vpop.f32.mrb[9].mxu0  ;;  %v2300_v20 = vpop.f32.mrb[9].mxu1 }
 0x314   : > { %v2224_v33 = vadd.f32 %v2223_v19, %v2142_v47  ;;  %v2301_v44 = vadd.f32 %v2300_v20, %v2142_v47 }
 0x315   : > { %v2341_v18 = vadd.f32 %v2337_v7, %v2222_v27  ;;  %v2393_v52 = vadd.f32 %v2389_v3, %v2299_v6 }
 0x316   : > { %v2342_v23 = vadd.f32 %v2338_v29, %v2224_v33  ;;  %v2394_v50 = vadd.f32 %v2390_v30, %v2301_v44  ;;  %v2227_v25 = vpop.f32.mrb[10].mxu0  ;;  %v2304_v53 = vpop.f32.mrb[10].mxu1 }
 0x317   : > { %v2345_v26 = vmax.f32 %v2341_v18, 0.0  ;;  %v2397_v51 = vmax.f32 %v2393_v52, 0.0  ;;  %v2228_v37 = vadd.f32 %v2227_v25, %v2147_v46  ;;  %v2305_v55 = vadd.f32 %v2304_v53, %v2147_v46  ;;  %v2229_v59 = vpop.f32.mrb[11].mxu0  ;;  %v2306_v62 = vpop.f32.mrb[11].mxu1 }
 0x318   : > { %v2346_v60 = vmax.f32 %v2342_v23, 0.0  ;;  %v2398_v56 = vmax.f32 %v2394_v50, 0.0  ;;  %v2230_v40 = vadd.f32 %v2229_v59, %v2147_v46  ;;  %v2307_v10 = vadd.f32 %v2306_v62, %v2147_v46 }
 0x319   : > { %v2349_v32 = vadd.f32 %v2345_v26, %v4607_v43  ;;  %v2401_v11 = vadd.f32 %v2397_v51, %v4615_v4  ;;  %v2343_v12 = vadd.f32 %v2339_v57, %v2228_v37  ;;  %v2395_v5 = vadd.f32 %v2391_v49, %v2305_v55 }
 0x31a   : > { %v2350_v61 = vadd.f32 %v2346_v60, %v4609_v54  ;;  %v2402_v1 = vadd.f32 %v2398_v56, %v4617_v63  ;;  %v2344_v21 = vadd.f32 %v2340_v45, %v2230_v40  ;;  %v2396_v0 = vadd.f32 %v2392_v58, %v2307_v10 }
 0x31b   : > { %v2592_v42 = vmul.f32 -1.442695, %v2349_v32  ;;  %v2600_v2 = vmul.f32 -1.442695, %v2401_v11  ;;  %v2347_v13 = vmax.f32 %v2343_v12, 0.0  ;;  %v2399_v39 = vmax.f32 %v2395_v5, 0.0 }
 0x31c   : > { %v2593_v14 = vmul.f32 -1.442695, %v2350_v61  ;;  %v2601_v48 = vmul.f32 -1.442695, %v2402_v1  ;;  %v2348_v35 = vmax.f32 %v2344_v21, 0.0  ;;  %v2400_v15 = vmax.f32 %v2396_v0, 0.0 }
 0x31d   : > { %3467 = vpow2.f32 %v2592_v42  ;;  %v2351_v43 = vadd.f32 %v2347_v13, %v4611_v36  ;;  %v2403_v4 = vadd.f32 %v2399_v39, %v4619_v9 }
 0x31e   : > { %3469 = vpow2.f32 %v2600_v2  ;;  %v2352_v54 = vadd.f32 %v2348_v35, %v4613_v28  ;;  %v2404_v63 = vadd.f32 %v2400_v15, %v4621_v8 }
 0x31f   : > { %3471 = vpow2.f32 %v2593_v14  ;;  %v2594_v38 = vmul.f32 -1.442695, %v2351_v43  ;;  %v2602_v31 = vmul.f32 -1.442695, %v2403_v4 }
 0x320   : > { %3473 = vpow2.f32 %v2601_v48  ;;  %v2595_v47 = vmul.f32 -1.442695, %v2352_v54  ;;  %v2603_v41 = vmul.f32 -1.442695, %v2404_v63 }
 0x321   : > { %3475 = vpow2.f32 %v2594_v38 }
 0x322   : > { %3477 = vpow2.f32 %v2602_v31 }
 0x323   : > { %3479 = vpow2.f32 %v2595_v47 }
 0x324   : > { %3481 = vpow2.f32 %v2603_v41 }
 0x327   : > { %v3468_v17 = vpop.eup %3467 }
 0x328   : > { %v3470_v24 = vpop.eup %3469  ;;  %v2365_v36 = vadd.f32 1.0, %v3468_v17 }
 0x329   : > { %v3472_v22 = vpop.eup %3471  ;;  %v2417_v9 = vadd.f32 1.0, %v3470_v24 }
 0x32a   : > { %v3474_v34 = vpop.eup %3473  ;;  %3483 = vrcp.f32 %v2365_v36  ;;  %v2366_v28 = vadd.f32 1.0, %v3472_v22 }
 0x32b   : > { %v3476_v16 = vpop.eup %3475  ;;  %3485 = vrcp.f32 %v2417_v9  ;;  %v2418_v8 = vadd.f32 1.0, %v3474_v34 }
 0x32c   : > { %v3478_v27 = vpop.eup %3477  ;;  %3487 = vrcp.f32 %v2366_v28  ;;  %v2367_v7 = vadd.f32 1.0, %v3476_v16 }
 0x32d   : > { %v3480_v6 = vpop.eup %3479  ;;  %3489 = vrcp.f32 %v2418_v8  ;;  %v2419_v3 = vadd.f32 1.0, %v3478_v27 }
 0x32e   : > { %v3482_v19 = vpop.eup %3481  ;;  %3491 = vrcp.f32 %v2367_v7  ;;  %v2368_v20 = vadd.f32 1.0, %v3480_v6 }
 0x32f   : > { %3493 = vrcp.f32 %v2419_v3  ;;  %v2420_v29 = vadd.f32 1.0, %v3482_v19 }
 0x330   : > { %3495 = vrcp.f32 %v2368_v20 }
 0x331   : > { %3497 = vrcp.f32 %v2420_v29 }
 0x334   : > { %v3484_v30 = vpop.eup %3483 }
 0x335   : > { %v3486_v33 = vpop.eup %3485  ;;  %2377 = vst [vmem:[%s3923_s2] sm:$0xff] %v3484_v30 }
 0x336   : > { %v3488_v44 = vpop.eup %3487  ;;  %2604 = vst [vmem:[%s3923_s2 + $0x20] sm:$0xff] %v3486_v33 }
 0x337   : > { %v3490_v45 = vpop.eup %3489  ;;  %2378 = vst [vmem:[%s3923_s2 + $0x8] sm:$0xff] %v3488_v44 }
 0x338   : > { %v3492_v18 = vpop.eup %3491  ;;  %2605 = vst [vmem:[%s3923_s2 + $0x28] sm:$0xff] %v3490_v45 }
 0x339   : > { %v3494_v52 = vpop.eup %3493  ;;  %2379 = vst [vmem:[%s3923_s2 + $0x10] sm:$0xff] %v3492_v18 }
 0x33a   : > { %v3496_v46 = vpop.eup %3495  ;;  %2606 = vst [vmem:[%s3923_s2 + $0x30] sm:$0xff] %v3494_v52 }
 0x33b   : > { %v3498_v57 = vpop.eup %3497  ;;  %2380 = vst [vmem:[%s3923_s2 + $0x18] sm:$0xff] %v3496_v46 }
 0x33c   : > { %2607 = vst [vmem:[%s3923_s2 + $0x38] sm:$0xff] %v3498_v57 }
 0x33d   : > { %3600 = shalt.err (!%p3597_p8)
}
 0x33e   : > { %s3601_s2 = scalar_lea.hbm %s4649_s0, 1024  ;;  %s3605_s20 = scalar_lea.hbm %s4704_s6, 2048 }
 0x33f   : > { %p3602_p9 = scmp.ne.s32.totalorder %s4649_s0, %s3601_s2  ;;  %p3606_p12 = scmp.lt.u32.totalorder %s4649_s0, %s4704_s6 }
 0x340   : > { %p3607_p13 = scmp.lt.u32.totalorder %s3605_s20, %s3601_s2  ;;  %p3609_p7 = scmp.lt.u32.totalorder %s3601_s2, %s4649_s0 }
 0x341   : > { %p3603_p0 = pnand %p3602_p9, %p3812_p11 }
 0x342   : > { %p3608_p3 = por %p3607_p13, %p3606_p12 }
 0x343   : > { %p3604_p4 = pneg %p3603_p0 }
 0x344   : > { %p3610_p10 = por %p3609_p7, %p3608_p3 }
 0x346   : > { %p3611_p1 = pnand %p3610_p10, %p3604_p4 }
 0x348   : > { %3614 = shalt.err (!%p3611_p1)
}
 0x349   : > { %s3680_s8 = smov 256   ;;  %s3681_s26 = smov 16  }
 0x34a   : > { %2916 = dma.vmem_to_hbm [thread:$0]  (%p3812_p11), %s4651_s16, 1024, %s4649_s0, %s2435_s25, %s3680_s8, %s3680_s8, %s3681_s26  }
 0x34b PF: > { %s2464_s15 = sand.u32 1, %s3649_s21   ;;  %p4748_p5 = scmp.ne.s32.totalorder %s4719_s28, 0 }
 0x34c   : > { %p4749_p2 = scmp.ge.s32.totalorder %s3661_s24, 2  ;;  %s2465_s23 = scalar_lea.sflag [#allocation6], %s2464_s15 }
 0x34e   : > { %p2930_p6 = pnand %p4749_p2, %p4748_p5 }
 0x350   : > { %3644 = dma.done.wait (!%p2930_p6), %s2465_s23, 1024  }
 0x351   : > { %3646 = vsyncadd (!%p2930_p6), %s2465_s23, 4294966272  ;;  %s4750_s24 = sld [smem:[#allocation16_spill]]  ;;  %s4751_s12 = sld [smem:[#allocation15_spill]] }
 0x352   : > { %s4752_s23 = sld [smem:[#allocation17_spill]]  ;;  %s4753_s21 = smov %s3653_s22 }
 0x357   : > { %p22_p8 = scmp.ge.s32.totalorder %s4750_s24, 4   ;;  %s4754_s22 = smov %s4751_s12 }
 0x359   :  { %24 = sbr.rel (!%p22_p8) target bundleno = 10 (0xa), region = 113 }
 0x360   :  { %2470 = vsyncpa [#allocation5], 1 }
 0x361   :  { %2472 = vsyncpa [#allocation5 + $0x1], 1 }
 0x362   :  { %2473 = vsyncpa [#allocation8], 1 }
 0x363   :  { %2475 = vsyncpa [#allocation8 + $0x1], 1 }
 0x364   :  { %2476 = vsyncpa [#allocation6], 1 }
 0x365   :  { %2478 = vsyncpa [#allocation6 + $0x1], 1 }

</bundles_post_ra>
